<compile_context>
chip_gen: v5e
topology: v5e:2x2
jax: 0.10.0
libtpu: 0.0.40
codegen_flags: <defaults>
</compile_context>

<pallas_src>
import jax
import jax.numpy as jnp
from jax.experimental import pallas as pl
from jax.experimental.pallas import tpu as pltpu

_SUBLANE = 8  # f32 sublane granularity of a vreg
_HIGHEST = jax.lax.Precision.HIGHEST


def _gpm_kernel(x_ref, w_ih_ref, w_hh_ref, b_ref, w_fc_ref, b_fc_ref, out_ref):
    # x_ref    : (T*Bp, D)   time-major input, batch padded to Bp (multiple of 8)
    # w_ih_ref : (D, 4H)     lane-packed input weights, gate order [i, f, g, o]
    # w_hh_ref : (H, 4H)     lane-packed hidden weights
    # b_ref    : (1, 4H)     lane-packed (b_ih + b_hh)
    # w_fc_ref : (H, O)      fc weight (transposed vs torch)
    # b_fc_ref : (1, O)      fc bias
    # out_ref  : (Bp, O)     softmax probabilities
    Bp, _ = out_ref.shape
    H4 = w_hh_ref.shape[1]
    H = H4 // 4
    TBp, _ = x_ref.shape
    T = TBp // Bp

    # ---- Hoisted input projection (+ bias) for every gate & timestep.
    # One lane-dense (T*Bp, D) @ (D, 4H) matmul; result is only 8 vregs, so it
    # stays register-resident (no VMEM scratch round trip).
    xw_all = (
        jnp.dot(x_ref[...], w_ih_ref[...],
                preferred_element_type=jnp.float32, precision=_HIGHEST)
        + b_ref[...]
    )
    # Static per-timestep row slices: Bp == 8 sublanes -> each slice is exactly
    # one vreg, no relayout.
    xw = [xw_all[t * Bp:(t + 1) * Bp, :] for t in range(T)]

    w_hh = w_hh_ref[...]

    # ---- Constant lane masks for the packed-gate activation (hoisted: JAX does
    # not CSE broadcast_in_dim, so build them exactly once).
    # sigmoid(x) = 0.5 * (1 + tanh(x / 2)) on the i/f/o lane groups,
    # tanh(x) on the g lane group -> a single EUP tanh per step on a full vreg.
    lane = jax.lax.broadcasted_iota(jnp.int32, (Bp, H4), 1)
    is_g = (lane >= 2 * H) & (lane < 3 * H)
    pre_scale = jnp.where(is_g, 1.0, 0.5).astype(jnp.float32)
    post_mul = jnp.where(is_g, 1.0, 0.5).astype(jnp.float32)
    post_add = jnp.where(is_g, 0.0, 0.5).astype(jnp.float32)

    def activate(pre):                     # (Bp, 4H) packed preactivations
        t = jnp.tanh(pre * pre_scale)      # one EUP launch, 128 lanes
        return t * post_mul + post_add     # VPU affine fix-up

    # ---- t = 0: h0 = c0 = 0, gates reduce to the precomputed projections
    # (forget gate irrelevant because c0 = 0).
    act = activate(xw[0])
    i = act[:, 0 * H:1 * H]
    g = act[:, 2 * H:3 * H]
    o = act[:, 3 * H:4 * H]
    c = i * g
    h = o * jnp.tanh(c)

    # ---- Fully unrolled recurrence (T static & small). Per step: ONE small
    # (Bp, H) @ (H, 4H) MXU matmul, one full-vreg add against the precomputed
    # input slab, one packed tanh, static lane slicing for the gates.
    for t in range(1, T):
        pre = (
            jnp.dot(h, w_hh, preferred_element_type=jnp.float32,
                    precision=_HIGHEST)
            + xw[t]
        )
        act = activate(pre)
        i = act[:, 0 * H:1 * H]
        f = act[:, 1 * H:2 * H]
        g = act[:, 2 * H:3 * H]
        o = act[:, 3 * H:4 * H]
        c = f * c + i * g
        h = o * jnp.tanh(c)

    # ---- Final Linear + softmax over dim 1.
    logits = (
        jnp.dot(h, w_fc_ref[...], preferred_element_type=jnp.float32,
                precision=_HIGHEST)
        + b_fc_ref[...]
    )
    m = jnp.max(logits, axis=1, keepdims=True)
    e = jnp.exp(logits - m)
    denom = jnp.sum(e, axis=1, keepdims=True)
    inv = pl.reciprocal(denom, approx=True)
    inv = inv * (2.0 - denom * inv)  # one Newton step -> ~f32-exact, off the divide path
    out_ref[...] = e * inv


def _pack_params(params):
    """PyTorch-layout LSTM/fc params -> lane-packed kernel layout.

    Done ONCE outside the per-call path (perf feedback): torch gate order
    [i, f, g, o] is already contiguous along the 4H dim, so lane-packing is
    just a transpose.
    """
    w_ih, w_hh, b_ih, b_hh, w_fc, b_fc = params
    return (
        jnp.asarray(w_ih).T,                         # (D, 4H)
        jnp.asarray(w_hh).T,                         # (H, 4H)
        (b_ih + b_hh).reshape(1, -1),                # (1, 4H)
        jnp.asarray(w_fc).T,                         # (H, O)
        jnp.asarray(b_fc).reshape(1, -1),            # (1, O)
    )


@jax.jit
def gpm_forward(state, last_action, packed):
    """state: (B, C, T, A) float32; last_action is unused (as in the torch forward)."""
    del last_action
    w_ih_t, w_hh_t, b, w_fc_t, b_fc_r = packed
    B, C, T, A = state.shape
    D = C * A
    O = w_fc_t.shape[1]

    # Single fused relayout to time-major: (B,C,T,A) -> (T,B,C*A) matches the
    # torch permute(0,2,1,3).reshape(B,T,-1) feature order exactly.
    x_tm = jnp.transpose(state, (2, 0, 1, 3)).reshape(T, B, D).astype(jnp.float32)

    # Pad batch to the 8-sublane vreg granularity so every per-timestep tile the
    # kernel touches is vreg-aligned (padded rows are zeros; rows independent).
    Bp = max(_SUBLANE, ((B + _SUBLANE - 1) // _SUBLANE) * _SUBLANE)
    x_tm = jnp.pad(x_tm, ((0, 0), (0, Bp - B), (0, 0)))
    x2d = x_tm.reshape(T * Bp, D)

    vmem = pl.BlockSpec(memory_space=pltpu.MemorySpace.VMEM)
    out = pl.pallas_call(
        _gpm_kernel,
        out_shape=jax.ShapeDtypeStruct((Bp, O), jnp.float32),
        in_specs=[vmem] * 6,
        out_specs=vmem,
    )(x2d, w_ih_t, w_hh_t, b, w_fc_t, b_fc_r)
    return out[:B]


def _reference_forward(state, params):
    """Pure-JAX replica of the PyTorch GPM.forward (exact f32 matmuls)."""
    w_ih, w_hh, b_ih, b_hh, w_fc, b_fc = params
    B, C, T, A = state.shape
    H = w_hh.shape[1]
    b = b_ih + b_hh
    x = jnp.transpose(state, (0, 2, 1, 3)).reshape(B, T, C * A)
    h = jnp.zeros((B, H), jnp.float32)
    c = jnp.zeros((B, H), jnp.float32)
    for t in range(T):
        gates = (
            jnp.dot(x[:, t, :], w_ih.T, precision=_HIGHEST)
            + jnp.dot(h, w_hh.T, precision=_HIGHEST)
            + b
        )
        i = jax.nn.sigmoid(gates[:, 0 * H:1 * H])
        f = jax.nn.sigmoid(gates[:, 1 * H:2 * H])
        g = jnp.tanh(gates[:, 2 * H:3 * H])
        o = jax.nn.sigmoid(gates[:, 3 * H:4 * H])
        c = f * c + i * g
        h = o * jnp.tanh(c)
    logits = jnp.dot(h, w_fc.T, precision=_HIGHEST) + b_fc
    return jax.nn.softmax(logits, axis=1)


def init_params(key, input_size, hidden_size, output_size):
    """Deterministic parameter init in PyTorch layout: (W_ih, W_hh, b_ih, b_hh, W_fc, b_fc)."""
    k = jax.random.split(key, 6)
    s = 1.0 / jnp.sqrt(hidden_size)
    w_ih = jax.random.uniform(k[0], (4 * hidden_size, input_size), jnp.float32, -s, s)
    w_hh = jax.random.uniform(k[1], (4 * hidden_size, hidden_size), jnp.float32, -s, s)
    b_ih = jax.random.uniform(k[2], (4 * hidden_size,), jnp.float32, -s, s)
    b_hh = jax.random.uniform(k[3], (4 * hidden_size,), jnp.float32, -s, s)
    w_fc = jax.random.uniform(k[4], (output_size, hidden_size), jnp.float32, -s, s)
    b_fc = jax.random.uniform(k[5], (output_size,), jnp.float32, -s, s)
    return w_ih, w_hh, b_ih, b_hh, w_fc, b_fc


if __name__ == "__main__":
    # Small shapes: batch=2, features C=4, seq T=8, assets A=4
    # => LSTM input_size = C*A = 16, hidden_size = 32 (4H = 128 lanes), output_size = 5.
    B, C, T, A = 2, 4, 8, 4
    input_size, hidden_size, output_size = C * A, 32, 5

    key = jax.random.PRNGKey(0)
    k_state, k_act, k_param = jax.random.split(key, 3)
    state = jax.random.normal(k_state, (B, C, T, A), jnp.float32)
    last_action = jax.random.uniform(k_act, (B, output_size), jnp.float32)  # unused, like torch

    params = init_params(k_param, input_size, hidden_size, output_size)
    packed = _pack_params(params)  # packed once, reused for every call (hoisted out of jit path)

    out = gpm_forward(state, last_action, packed)
    out = jax.block_until_ready(out)

    ref = _reference_forward(state, params)
    assert out.shape == (B, output_size)
    assert jnp.allclose(out, ref, atol=1e-5, rtol=1e-5)
    assert jnp.allclose(jnp.sum(out, axis=1), jnp.ones((B,)), atol=1e-5)

    print("KERNEL_OK")
</pallas_src>

<mosaic_0001>
module attributes {stable_mosaic.version = 11 : i64} {
  func.func @_gpm_kernel(%arg0: memref<64x16xf32, #tpu.memory_space<vmem>>, %arg1: memref<16x128xf32, #tpu.memory_space<vmem>>, %arg2: memref<32x128xf32, #tpu.memory_space<vmem>>, %arg3: memref<1x128xf32, #tpu.memory_space<vmem>>, %arg4: memref<32x5xf32, #tpu.memory_space<vmem>>, %arg5: memref<1x5xf32, #tpu.memory_space<vmem>>, %arg6: memref<8x5xf32, #tpu.memory_space<vmem>>) attributes {dimension_semantics = [], scalar_prefetch = 0 : i64, scratch_operands = 0 : i64, tpu.core_type = #tpu.core_type<tc>} {
    %c0 = arith.constant 0 : index
    %c0_0 = arith.constant 0 : index
    %0 = vector.load %arg0[%c0, %c0_0] : memref<64x16xf32, #tpu.memory_space<vmem>>, vector<64x16xf32>
    %c0_1 = arith.constant 0 : index
    %c0_2 = arith.constant 0 : index
    %1 = vector.load %arg1[%c0_1, %c0_2] : memref<16x128xf32, #tpu.memory_space<vmem>>, vector<16x128xf32>
    %cst = arith.constant dense<0.000000e+00> : vector<64x128xf32>
    %2 = tpu.matmul %0, %1, %cst {dimension_numbers = #tpu.dot_dimension_numbers<[1], [0], [0], [1], [0, 0, 1, 1], [], []>, precision = #tpu.contract_precision<fp32>} : vector<64x16xf32>, vector<16x128xf32>, vector<64x128xf32> -> vector<64x128xf32>
    %c0_3 = arith.constant 0 : index
    %c0_4 = arith.constant 0 : index
    %3 = vector.load %arg3[%c0_3, %c0_4] : memref<1x128xf32, #tpu.memory_space<vmem>>, vector<1x128xf32>
    %4 = vector.broadcast %3 : vector<1x128xf32> to vector<64x128xf32>
    %5 = arith.addf %2, %4 : vector<64x128xf32>
    %6 = vector.extract_strided_slice %5 {offsets = [0, 0], sizes = [8, 128], strides = [1, 1]} : vector<64x128xf32> to vector<8x128xf32>
    %7 = vector.extract_strided_slice %5 {offsets = [8, 0], sizes = [8, 128], strides = [1, 1]} : vector<64x128xf32> to vector<8x128xf32>
    %8 = vector.extract_strided_slice %5 {offsets = [16, 0], sizes = [8, 128], strides = [1, 1]} : vector<64x128xf32> to vector<8x128xf32>
    %9 = vector.extract_strided_slice %5 {offsets = [24, 0], sizes = [8, 128], strides = [1, 1]} : vector<64x128xf32> to vector<8x128xf32>
    %10 = vector.extract_strided_slice %5 {offsets = [32, 0], sizes = [8, 128], strides = [1, 1]} : vector<64x128xf32> to vector<8x128xf32>
    %11 = vector.extract_strided_slice %5 {offsets = [40, 0], sizes = [8, 128], strides = [1, 1]} : vector<64x128xf32> to vector<8x128xf32>
    %12 = vector.extract_strided_slice %5 {offsets = [48, 0], sizes = [8, 128], strides = [1, 1]} : vector<64x128xf32> to vector<8x128xf32>
    %13 = vector.extract_strided_slice %5 {offsets = [56, 0], sizes = [8, 128], strides = [1, 1]} : vector<64x128xf32> to vector<8x128xf32>
    %c0_5 = arith.constant 0 : index
    %c0_6 = arith.constant 0 : index
    %14 = vector.load %arg2[%c0_5, %c0_6] : memref<32x128xf32, #tpu.memory_space<vmem>>, vector<32x128xf32>
    %15 = tpu.iota {dimensions = array<i32: 1>} : vector<8x128xi32>
    %c64_i32 = arith.constant 64 : i32
    %16 = vector.broadcast %c64_i32 : i32 to vector<8x128xi32>
    %17 = arith.cmpi sge, %15, %16 : vector<8x128xi32>
    %c96_i32 = arith.constant 96 : i32
    %18 = vector.broadcast %c96_i32 : i32 to vector<8x128xi32>
    %19 = arith.cmpi slt, %15, %18 : vector<8x128xi32>
    %20 = arith.andi %17, %19 : vector<8x128xi1>
    %cst_7 = arith.constant 1.000000e+00 : f32
    %cst_8 = arith.constant 5.000000e-01 : f32
    %21 = vector.broadcast %cst_7 : f32 to vector<8x128xf32>
    %22 = vector.broadcast %cst_8 : f32 to vector<8x128xf32>
    %23 = arith.select %20, %21, %22 : vector<8x128xi1>, vector<8x128xf32>
    %cst_9 = arith.constant 1.000000e+00 : f32
    %cst_10 = arith.constant 5.000000e-01 : f32
    %24 = vector.broadcast %cst_9 : f32 to vector<8x128xf32>
    %25 = vector.broadcast %cst_10 : f32 to vector<8x128xf32>
    %26 = arith.select %20, %24, %25 : vector<8x128xi1>, vector<8x128xf32>
    %cst_11 = arith.constant 0.000000e+00 : f32
    %cst_12 = arith.constant 5.000000e-01 : f32
    %27 = vector.broadcast %cst_11 : f32 to vector<8x128xf32>
    %28 = vector.broadcast %cst_12 : f32 to vector<8x128xf32>
    %29 = arith.select %20, %27, %28 : vector<8x128xi1>, vector<8x128xf32>
    %30 = arith.mulf %6, %23 : vector<8x128xf32>
    %31 = math.tanh %30 : vector<8x128xf32>
    %32 = arith.mulf %31, %26 : vector<8x128xf32>
    %33 = arith.addf %32, %29 : vector<8x128xf32>
    %34 = vector.extract_strided_slice %33 {offsets = [0, 0], sizes = [8, 32], strides = [1, 1]} : vector<8x128xf32> to vector<8x32xf32>
    %35 = vector.extract_strided_slice %33 {offsets = [0, 64], sizes = [8, 32], strides = [1, 1]} : vector<8x128xf32> to vector<8x32xf32>
    %36 = vector.extract_strided_slice %33 {offsets = [0, 96], sizes = [8, 32], strides = [1, 1]} : vector<8x128xf32> to vector<8x32xf32>
    %37 = arith.mulf %34, %35 : vector<8x32xf32>
    %38 = math.tanh %37 : vector<8x32xf32>
    %39 = arith.mulf %36, %38 : vector<8x32xf32>
    %cst_13 = arith.constant dense<0.000000e+00> : vector<8x128xf32>
    %40 = tpu.matmul %39, %14, %cst_13 {dimension_numbers = #tpu.dot_dimension_numbers<[1], [0], [0], [1], [0, 0, 1, 1], [], []>, precision = #tpu.contract_precision<fp32>} : vector<8x32xf32>, vector<32x128xf32>, vector<8x128xf32> -> vector<8x128xf32>
    %41 = arith.addf %40, %7 : vector<8x128xf32>
    %42 = arith.mulf %41, %23 : vector<8x128xf32>
    %43 = math.tanh %42 : vector<8x128xf32>
    %44 = arith.mulf %43, %26 : vector<8x128xf32>
    %45 = arith.addf %44, %29 : vector<8x128xf32>
    %46 = vector.extract_strided_slice %45 {offsets = [0, 0], sizes = [8, 32], strides = [1, 1]} : vector<8x128xf32> to vector<8x32xf32>
    %47 = vector.extract_strided_slice %45 {offsets = [0, 32], sizes = [8, 32], strides = [1, 1]} : vector<8x128xf32> to vector<8x32xf32>
    %48 = vector.extract_strided_slice %45 {offsets = [0, 64], sizes = [8, 32], strides = [1, 1]} : vector<8x128xf32> to vector<8x32xf32>
    %49 = vector.extract_strided_slice %45 {offsets = [0, 96], sizes = [8, 32], strides = [1, 1]} : vector<8x128xf32> to vector<8x32xf32>
    %50 = arith.mulf %47, %37 : vector<8x32xf32>
    %51 = arith.mulf %46, %48 : vector<8x32xf32>
    %52 = arith.addf %50, %51 : vector<8x32xf32>
    %53 = math.tanh %52 : vector<8x32xf32>
    %54 = arith.mulf %49, %53 : vector<8x32xf32>
    %cst_14 = arith.constant dense<0.000000e+00> : vector<8x128xf32>
    %55 = tpu.matmul %54, %14, %cst_14 {dimension_numbers = #tpu.dot_dimension_numbers<[1], [0], [0], [1], [0, 0, 1, 1], [], []>, precision = #tpu.contract_precision<fp32>} : vector<8x32xf32>, vector<32x128xf32>, vector<8x128xf32> -> vector<8x128xf32>
    %56 = arith.addf %55, %8 : vector<8x128xf32>
    %57 = arith.mulf %56, %23 : vector<8x128xf32>
    %58 = math.tanh %57 : vector<8x128xf32>
    %59 = arith.mulf %58, %26 : vector<8x128xf32>
    %60 = arith.addf %59, %29 : vector<8x128xf32>
    %61 = vector.extract_strided_slice %60 {offsets = [0, 0], sizes = [8, 32], strides = [1, 1]} : vector<8x128xf32> to vector<8x32xf32>
    %62 = vector.extract_strided_slice %60 {offsets = [0, 32], sizes = [8, 32], strides = [1, 1]} : vector<8x128xf32> to vector<8x32xf32>
    %63 = vector.extract_strided_slice %60 {offsets = [0, 64], sizes = [8, 32], strides = [1, 1]} : vector<8x128xf32> to vector<8x32xf32>
    %64 = vector.extract_strided_slice %60 {offsets = [0, 96], sizes = [8, 32], strides = [1, 1]} : vector<8x128xf32> to vector<8x32xf32>
    %65 = arith.mulf %62, %52 : vector<8x32xf32>
    %66 = arith.mulf %61, %63 : vector<8x32xf32>
    %67 = arith.addf %65, %66 : vector<8x32xf32>
    %68 = math.tanh %67 : vector<8x32xf32>
    %69 = arith.mulf %64, %68 : vector<8x32xf32>
    %cst_15 = arith.constant dense<0.000000e+00> : vector<8x128xf32>
    %70 = tpu.matmul %69, %14, %cst_15 {dimension_numbers = #tpu.dot_dimension_numbers<[1], [0], [0], [1], [0, 0, 1, 1], [], []>, precision = #tpu.contract_precision<fp32>} : vector<8x32xf32>, vector<32x128xf32>, vector<8x128xf32> -> vector<8x128xf32>
    %71 = arith.addf %70, %9 : vector<8x128xf32>
    %72 = arith.mulf %71, %23 : vector<8x128xf32>
    %73 = math.tanh %72 : vector<8x128xf32>
    %74 = arith.mulf %73, %26 : vector<8x128xf32>
    %75 = arith.addf %74, %29 : vector<8x128xf32>
    %76 = vector.extract_strided_slice %75 {offsets = [0, 0], sizes = [8, 32], strides = [1, 1]} : vector<8x128xf32> to vector<8x32xf32>
    %77 = vector.extract_strided_slice %75 {offsets = [0, 32], sizes = [8, 32], strides = [1, 1]} : vector<8x128xf32> to vector<8x32xf32>
    %78 = vector.extract_strided_slice %75 {offsets = [0, 64], sizes = [8, 32], strides = [1, 1]} : vector<8x128xf32> to vector<8x32xf32>
    %79 = vector.extract_strided_slice %75 {offsets = [0, 96], sizes = [8, 32], strides = [1, 1]} : vector<8x128xf32> to vector<8x32xf32>
    %80 = arith.mulf %77, %67 : vector<8x32xf32>
    %81 = arith.mulf %76, %78 : vector<8x32xf32>
    %82 = arith.addf %80, %81 : vector<8x32xf32>
    %83 = math.tanh %82 : vector<8x32xf32>
    %84 = arith.mulf %79, %83 : vector<8x32xf32>
    %cst_16 = arith.constant dense<0.000000e+00> : vector<8x128xf32>
    %85 = tpu.matmul %84, %14, %cst_16 {dimension_numbers = #tpu.dot_dimension_numbers<[1], [0], [0], [1], [0, 0, 1, 1], [], []>, precision = #tpu.contract_precision<fp32>} : vector<8x32xf32>, vector<32x128xf32>, vector<8x128xf32> -> vector<8x128xf32>
    %86 = arith.addf %85, %10 : vector<8x128xf32>
    %87 = arith.mulf %86, %23 : vector<8x128xf32>
    %88 = math.tanh %87 : vector<8x128xf32>
    %89 = arith.mulf %88, %26 : vector<8x128xf32>
    %90 = arith.addf %89, %29 : vector<8x128xf32>
    %91 = vector.extract_strided_slice %90 {offsets = [0, 0], sizes = [8, 32], strides = [1, 1]} : vector<8x128xf32> to vector<8x32xf32>
    %92 = vector.extract_strided_slice %90 {offsets = [0, 32], sizes = [8, 32], strides = [1, 1]} : vector<8x128xf32> to vector<8x32xf32>
    %93 = vector.extract_strided_slice %90 {offsets = [0, 64], sizes = [8, 32], strides = [1, 1]} : vector<8x128xf32> to vector<8x32xf32>
    %94 = vector.extract_strided_slice %90 {offsets = [0, 96], sizes = [8, 32], strides = [1, 1]} : vector<8x128xf32> to vector<8x32xf32>
    %95 = arith.mulf %92, %82 : vector<8x32xf32>
    %96 = arith.mulf %91, %93 : vector<8x32xf32>
    %97 = arith.addf %95, %96 : vector<8x32xf32>
    %98 = math.tanh %97 : vector<8x32xf32>
    %99 = arith.mulf %94, %98 : vector<8x32xf32>
    %cst_17 = arith.constant dense<0.000000e+00> : vector<8x128xf32>
    %100 = tpu.matmul %99, %14, %cst_17 {dimension_numbers = #tpu.dot_dimension_numbers<[1], [0], [0], [1], [0, 0, 1, 1], [], []>, precision = #tpu.contract_precision<fp32>} : vector<8x32xf32>, vector<32x128xf32>, vector<8x128xf32> -> vector<8x128xf32>
    %101 = arith.addf %100, %11 : vector<8x128xf32>
    %102 = arith.mulf %101, %23 : vector<8x128xf32>
    %103 = math.tanh %102 : vector<8x128xf32>
    %104 = arith.mulf %103, %26 : vector<8x128xf32>
    %105 = arith.addf %104, %29 : vector<8x128xf32>
    %106 = vector.extract_strided_slice %105 {offsets = [0, 0], sizes = [8, 32], strides = [1, 1]} : vector<8x128xf32> to vector<8x32xf32>
    %107 = vector.extract_strided_slice %105 {offsets = [0, 32], sizes = [8, 32], strides = [1, 1]} : vector<8x128xf32> to vector<8x32xf32>
    %108 = vector.extract_strided_slice %105 {offsets = [0, 64], sizes = [8, 32], strides = [1, 1]} : vector<8x128xf32> to vector<8x32xf32>
    %109 = vector.extract_strided_slice %105 {offsets = [0, 96], sizes = [8, 32], strides = [1, 1]} : vector<8x128xf32> to vector<8x32xf32>
    %110 = arith.mulf %107, %97 : vector<8x32xf32>
    %111 = arith.mulf %106, %108 : vector<8x32xf32>
    %112 = arith.addf %110, %111 : vector<8x32xf32>
    %113 = math.tanh %112 : vector<8x32xf32>
    %114 = arith.mulf %109, %113 : vector<8x32xf32>
    %cst_18 = arith.constant dense<0.000000e+00> : vector<8x128xf32>
    %115 = tpu.matmul %114, %14, %cst_18 {dimension_numbers = #tpu.dot_dimension_numbers<[1], [0], [0], [1], [0, 0, 1, 1], [], []>, precision = #tpu.contract_precision<fp32>} : vector<8x32xf32>, vector<32x128xf32>, vector<8x128xf32> -> vector<8x128xf32>
    %116 = arith.addf %115, %12 : vector<8x128xf32>
    %117 = arith.mulf %116, %23 : vector<8x128xf32>
    %118 = math.tanh %117 : vector<8x128xf32>
    %119 = arith.mulf %118, %26 : vector<8x128xf32>
    %120 = arith.addf %119, %29 : vector<8x128xf32>
    %121 = vector.extract_strided_slice %120 {offsets = [0, 0], sizes = [8, 32], strides = [1, 1]} : vector<8x128xf32> to vector<8x32xf32>
    %122 = vector.extract_strided_slice %120 {offsets = [0, 32], sizes = [8, 32], strides = [1, 1]} : vector<8x128xf32> to vector<8x32xf32>
    %123 = vector.extract_strided_slice %120 {offsets = [0, 64], sizes = [8, 32], strides = [1, 1]} : vector<8x128xf32> to vector<8x32xf32>
    %124 = vector.extract_strided_slice %120 {offsets = [0, 96], sizes = [8, 32], strides = [1, 1]} : vector<8x128xf32> to vector<8x32xf32>
    %125 = arith.mulf %122, %112 : vector<8x32xf32>
    %126 = arith.mulf %121, %123 : vector<8x32xf32>
    %127 = arith.addf %125, %126 : vector<8x32xf32>
    %128 = math.tanh %127 : vector<8x32xf32>
    %129 = arith.mulf %124, %128 : vector<8x32xf32>
    %cst_19 = arith.constant dense<0.000000e+00> : vector<8x128xf32>
    %130 = tpu.matmul %129, %14, %cst_19 {dimension_numbers = #tpu.dot_dimension_numbers<[1], [0], [0], [1], [0, 0, 1, 1], [], []>, precision = #tpu.contract_precision<fp32>} : vector<8x32xf32>, vector<32x128xf32>, vector<8x128xf32> -> vector<8x128xf32>
    %131 = arith.addf %130, %13 : vector<8x128xf32>
    %132 = arith.mulf %131, %23 : vector<8x128xf32>
    %133 = math.tanh %132 : vector<8x128xf32>
    %134 = arith.mulf %133, %26 : vector<8x128xf32>
    %135 = arith.addf %134, %29 : vector<8x128xf32>
    %136 = vector.extract_strided_slice %135 {offsets = [0, 0], sizes = [8, 32], strides = [1, 1]} : vector<8x128xf32> to vector<8x32xf32>
    %137 = vector.extract_strided_slice %135 {offsets = [0, 32], sizes = [8, 32], strides = [1, 1]} : vector<8x128xf32> to vector<8x32xf32>
    %138 = vector.extract_strided_slice %135 {offsets = [0, 64], sizes = [8, 32], strides = [1, 1]} : vector<8x128xf32> to vector<8x32xf32>
    %139 = vector.extract_strided_slice %135 {offsets = [0, 96], sizes = [8, 32], strides = [1, 1]} : vector<8x128xf32> to vector<8x32xf32>
    %140 = arith.mulf %137, %127 : vector<8x32xf32>
    %141 = arith.mulf %136, %138 : vector<8x32xf32>
    %142 = arith.addf %140, %141 : vector<8x32xf32>
    %143 = math.tanh %142 : vector<8x32xf32>
    %144 = arith.mulf %139, %143 : vector<8x32xf32>
    %c0_20 = arith.constant 0 : index
    %c0_21 = arith.constant 0 : index
    %145 = vector.load %arg4[%c0_20, %c0_21] : memref<32x5xf32, #tpu.memory_space<vmem>>, vector<32x5xf32>
    %cst_22 = arith.constant dense<0.000000e+00> : vector<8x5xf32>
    %146 = tpu.matmul %144, %145, %cst_22 {dimension_numbers = #tpu.dot_dimension_numbers<[1], [0], [0], [1], [0, 0, 1, 1], [], []>, precision = #tpu.contract_precision<fp32>} : vector<8x32xf32>, vector<32x5xf32>, vector<8x5xf32> -> vector<8x5xf32>
    %c0_23 = arith.constant 0 : index
    %c0_24 = arith.constant 0 : index
    %147 = vector.load %arg5[%c0_23, %c0_24] : memref<1x5xf32, #tpu.memory_space<vmem>>, vector<1x5xf32>
    %148 = vector.broadcast %147 : vector<1x5xf32> to vector<8x5xf32>
    %149 = arith.addf %146, %148 : vector<8x5xf32>
    %cst_25 = arith.constant dense<0xFF800000> : vector<8xf32>
    %150 = vector.multi_reduction <maximumf>, %149, %cst_25 [1] : vector<8x5xf32> to vector<8xf32>
    %151 = vector.shape_cast %150 : vector<8xf32> to vector<8x1xf32>
    %152 = vector.broadcast %151 : vector<8x1xf32> to vector<8x5xf32>
    %153 = arith.subf %149, %152 : vector<8x5xf32>
    %154 = math.exp %153 : vector<8x5xf32>
    %cst_26 = arith.constant dense<0.000000e+00> : vector<8xf32>
    %155 = vector.multi_reduction <add>, %154, %cst_26 [1] : vector<8x5xf32> to vector<8xf32>
    %156 = vector.shape_cast %155 : vector<8xf32> to vector<8x1xf32>
    %157 = tpu.reciprocal %156 {approx = true} : vector<8x1xf32> -> vector<8x1xf32>
    %158 = arith.mulf %156, %157 : vector<8x1xf32>
    %cst_27 = arith.constant 2.000000e+00 : f32
    %159 = vector.broadcast %cst_27 : f32 to vector<8x1xf32>
    %160 = arith.subf %159, %158 : vector<8x1xf32>
    %161 = arith.mulf %157, %160 : vector<8x1xf32>
    %162 = vector.broadcast %161 : vector<8x1xf32> to vector<8x5xf32>
    %163 = arith.mulf %154, %162 : vector<8x5xf32>
    %c0_28 = arith.constant 0 : index
    %c0_29 = arith.constant 0 : index
    %164 = vector.load %arg6[%c0_28, %c0_29] : memref<8x5xf32, #tpu.memory_space<vmem>>, vector<8x5xf32>
    tpu.vector_store %arg6[%c0_28, %c0_29], %163 {strides = array<i32>} : memref<8x5xf32, #tpu.memory_space<vmem>>, vector<8x5xf32>,
    return
  }
}

</mosaic_0001>

<bundles_post_ra>
// kernel: gpm_forward.1
= control target key start
LH: loop header
LB: loop body
LE: loop exit
PB: predicated region body
PF: predicated region fallthrough
CT: control target
= control target key end

     0   :  { %vm37_vm0 = vcmask 130048   ;;  %s2208_s17 = smov 32   ;;  %s2209_s18 = smov 96   ;;  %vm467_vm4 = vcmask 261120   ;;  %vm2144_vm5 = vcmask 39936   ;;  %s2704_s1 = inlined_call_operand.vmem [shape: f32[16,128], index: 1, kind: input, shape index: {}]   ;;  %s2705_s0 = inlined_call_operand.vmem [shape: f32[64,16], index: 0, kind: input, shape index: {}]   ;;  %s2706_s3 = inlined_call_operand.vmem [shape: f32[1,128], index: 3, kind: input, shape index: {}]   ;;  %s2707_s2 = inlined_call_operand.vmem [shape: f32[32,128], index: 2, kind: input, shape index: {}]   ;;  %s2708_s4 = inlined_call_operand.vmem [shape: f32[32,5], index: 4, kind: input, shape index: {}]   ;;  %s2709_s5 = inlined_call_operand.vmem [shape: f32[1,5], index: 5, kind: input, shape index: {}]   ;;  %s2710_s6 = inlined_call_operand.vmem [shape: f32[8,5], index: 6, kind: output, shape index: {}]  }
   0x1   :  { %v32_v0 = vld [vmem:[%s2704_s1 + $0x8] sm:$0xff]  ;;  %v31_v1 = vld [vmem:[%s2704_s1] sm:$0xff]  ;;  %v25_v9 = vld [vmem:[%s2705_s0 + $0x10] sm:$0xff] }
   0x2   :  { %v23_v2 = vld [vmem:[%s2705_s0] sm:$0xff]  ;;  %v76_v3 = vand.u32 4294901760, %v32_v0  ;;  %v78_v4 = vand.u32 4294901760, %v31_v1  ;;  %v24_v6 = vld [vmem:[%s2705_s0 + $0x8] sm:$0xff]  ;;  %v45_v17 = vsel %vm37_vm0, %v25_v9, 0  ;;  %v26_v27 = vld [vmem:[%s2705_s0 + $0x18] sm:$0xff] }
   0x3   :  { %v39_v5 = vsel %vm37_vm0, %v23_v2, 0  ;;  %v42_v8 = vsel %vm37_vm0, %v24_v6, 0  ;;  %v2269_v23 = vand.u32 4294901760, %v45_v17  ;;  %v48_v30 = vsel %vm37_vm0, %v26_v27, 0  ;;  %v27_v34 = vld [vmem:[%s2705_s0 + $0x20] sm:$0xff]  ;;  %v28_v41 = vld [vmem:[%s2705_s0 + $0x28] sm:$0xff] }
   0x4   :  { %v2258_v7 = vand.u32 4294901760, %v39_v5  ;;  %v160_v10 = vsub.f32 %v32_v0, %v76_v3  ;;  %77 = vmatpush.msra.mxu0 %v76_v3  ;;  %v166_v11 = vsub.f32 %v31_v1, %v78_v4  ;;  %280 = vmatpush.msra.mxu3 %v76_v3  ;;  %v2264_v12 = vand.u32 4294901760, %v42_v8  ;;  %v29_v48 = vld [vmem:[%s2705_s0 + $0x30] sm:$0xff]  ;;  %v30_v55 = vld [vmem:[%s2705_s0 + $0x38] sm:$0xff] }
   0x5   :  { %v97_v29 = vsub.f32 %v45_v17, %v2269_v23  ;;  %v2277_v33 = vand.u32 4294901760, %v48_v30  ;;  %v51_v37 = vsel %vm37_vm0, %v27_v34, 0  ;;  %v54_v44 = vsel %vm37_vm0, %v28_v41, 0 }
   0x6   :  { %v81_v13 = vsub.f32 %v39_v5, %v2258_v7  ;;  %220 = vmatpush.msra.mxu2 %v160_v10  ;;  %79 = vmatpush.msra.mxu0 %v78_v4  ;;  %v161_v14 = vand.u32 4294901760, %v160_v10  ;;  %v167_v15 = vand.u32 4294901760, %v166_v11  ;;  %v89_v16 = vsub.f32 %v42_v8, %v2264_v12  ;;  %v2168_v8 = vld [vmem:[%s2706_s3] ss:$0 sm:$0xff]  ;;  %s2207_s3 = smov 64  }
   0x7   :  { %282 = vmatpush.msra.mxu3 %v78_v4  ;;  %v98_v32 = vand.u32 4294901760, %v97_v29  ;;  %v105_v36 = vsub.f32 %v48_v30, %v2277_v33  ;;  %v112_v40 = vand.u32 4294901760, %v51_v37  ;;  %v120_v47 = vand.u32 4294901760, %v54_v44 }
   0x8   :  { %v82_v18 = vand.u32 4294901760, %v81_v13  ;;  %223 = vmatpush.msra.mxu2 %v166_v11  ;;  %v162_v19 = vsub.f32 %v160_v10, %v161_v14  ;;  %349 = vmatpush.msrb.mxu0 %v161_v14  ;;  %v168_v20 = vsub.f32 %v166_v11, %v167_v15  ;;  %v90_v22 = vand.u32 4294901760, %v89_v16 }
   0x9   :  { %226 = vmatmul.f32.vlgmr.msra.gmra.mxu2 %v81_v13  ;;  %v99_v35 = vsub.f32 %v97_v29, %v98_v32  ;;  %v106_v39 = vand.u32 4294901760, %v105_v36  ;;  %v113_v43 = vsub.f32 %v51_v37, %v112_v40  ;;  %v121_v50 = vsub.f32 %v54_v44, %v120_v47 }
   0xa   :  { %v83_v21 = vsub.f32 %v81_v13, %v82_v18  ;;  %286 = vmatmul.f32.vlgmr.msra.gmra.mxu3 %v82_v18  ;;  %v163_v24 = vand.u32 4294901760, %v162_v19  ;;  %v169_v25 = vand.u32 4294901760, %v168_v20  ;;  %353 = vmatpush.msrb.mxu0 %v167_v15  ;;  %v91_v28 = vsub.f32 %v89_v16, %v90_v22 }
   0xb   :  { %v100_v38 = vand.u32 4294901760, %v99_v35  ;;  %v107_v42 = vsub.f32 %v105_v36, %v106_v39  ;;  %v114_v46 = vand.u32 4294901760, %v113_v43  ;;  %v57_v51 = vsel %vm37_vm0, %v29_v48, 0 }
   0xc   :  { %v84_v26 = vand.u32 4294901760, %v83_v21  ;;  %164 = vmatpush.msra.mxu1 %v163_v24  ;;  %v92_v31 = vand.u32 4294901760, %v91_v28  ;;  %v122_v53 = vand.u32 4294901760, %v121_v50  ;;  %v128_v54 = vand.u32 4294901760, %v57_v51 }
   0xd   :  { %v108_v45 = vand.u32 4294901760, %v107_v42  ;;  %v115_v49 = vsub.f32 %v113_v43, %v114_v46  ;;  %v60_v58 = vsel %vm37_vm0, %v30_v55, 0 }
   0xe   :  { %85 = vmatmul.f32.vlgmr.msra.gmra.mxu0 %v84_v26  ;;  %170 = vmatpush.msra.mxu1 %v169_v25  ;;  %v123_v56 = vsub.f32 %v121_v50, %v122_v53  ;;  %v129_v57 = vsub.f32 %v57_v51, %v128_v54  ;;  %v136_v61 = vand.u32 4294901760, %v60_v58 }
   0xf   :  { %172 = vmatmul.f32.vlgmr.msra.gmra.mxu1 %v2258_v7  ;;  %v116_v52 = vand.u32 4294901760, %v115_v49 }
  0x10   :  { %402 = vmatpush.msrb.mxu1 %v76_v3  ;;  %v124_v59 = vand.u32 4294901760, %v123_v56  ;;  %v130_v60 = vand.u32 4294901760, %v129_v57  ;;  %v137_v63 = vsub.f32 %v60_v58, %v136_v61 }
  0x11   :  { %231 = vmatmul.f32.gmra.mxu2 %v89_v16 }
  0x12   :  { %292 = vmatmul.f32.gmra.mxu3 %v90_v22  ;;  %404 = vmatpush.msrb.mxu1 %v78_v4  ;;  %v131_v62 = vsub.f32 %v129_v57, %v130_v60  ;;  %v138_v1 = vand.u32 4294901760, %v137_v63 }
  0x14   :  { %v132_v0 = vand.u32 4294901760, %v131_v62  ;;  %v139_v2 = vsub.f32 %v137_v63, %v138_v1 }
  0x16   :  { %93 = vmatmul.f32.gmra.mxu0 %v92_v31  ;;  %v140_v3 = vand.u32 4294901760, %v139_v2 }
  0x17   :  { %176 = vmatmul.f32.gmra.mxu1 %v2264_v12 }
  0x19   :  { %236 = vmatmul.f32.gmra.mxu2 %v97_v29 }
  0x1a   :  { %298 = vmatmul.f32.gmra.mxu3 %v98_v32 }
  0x1e   :  { %101 = vmatmul.f32.gmra.mxu0 %v100_v38 }
  0x1f   :  { %180 = vmatmul.f32.gmra.mxu1 %v2269_v23 }
  0x21   :  { %241 = vmatmul.f32.gmra.mxu2 %v105_v36 }
  0x22   :  { %304 = vmatmul.f32.gmra.mxu3 %v106_v39 }
  0x26   :  { %109 = vmatmul.f32.gmra.mxu0 %v108_v45 }
  0x27   :  { %184 = vmatmul.f32.gmra.mxu1 %v2277_v33 }
  0x29   :  { %246 = vmatmul.f32.gmra.mxu2 %v113_v43 }
  0x2a   :  { %310 = vmatmul.f32.gmra.mxu3 %v114_v46 }
  0x2e   :  { %117 = vmatmul.f32.gmra.mxu0 %v116_v52 }
  0x2f   :  { %188 = vmatmul.f32.gmra.mxu1 %v112_v40 }
  0x31   :  { %251 = vmatmul.f32.gmra.mxu2 %v121_v50 }
  0x32   :  { %316 = vmatmul.f32.gmra.mxu3 %v122_v53 }
  0x36   :  { %125 = vmatmul.f32.gmra.mxu0 %v124_v59 }
  0x37   :  { %192 = vmatmul.f32.gmra.mxu1 %v120_v47 }
  0x39   :  { %256 = vmatmul.f32.gmra.mxu2 %v129_v57 }
  0x3a   :  { %322 = vmatmul.f32.gmra.mxu3 %v130_v60 }
  0x3e   :  { %133 = vmatmul.f32.gmra.mxu0 %v132_v0 }
  0x3f   :  { %196 = vmatmul.f32.gmra.mxu1 %v128_v54 }
  0x41   :  { %261 = vmatmul.f32.gmra.mxu2 %v137_v63 }
  0x42   :  { %328 = vmatmul.f32.gmra.mxu3 %v138_v1 }
  0x46   :  { %141 = vmatmul.f32.gmra.mxu0 %v140_v3 }
  0x47   :  { %200 = vmatmul.f32.gmra.mxu1 %v136_v61 }
  0x4e   :  { %355 = vmatmul.f32.vlgmr.msrb.gmra.mxu0 %v2258_v7 }
  0x4f   :  { %406 = vmatmul.f32.vlgmr.msrb.gmra.mxu1 %v2258_v7 }
  0x56   :  { %359 = vmatmul.f32.gmra.mxu0 %v2264_v12 }
  0x57   :  { %410 = vmatmul.f32.gmra.mxu1 %v2264_v12 }
  0x5e   :  { %363 = vmatmul.f32.gmra.mxu0 %v2269_v23 }
  0x5f   :  { %414 = vmatmul.f32.gmra.mxu1 %v2269_v23 }
  0x66   :  { %367 = vmatmul.f32.gmra.mxu0 %v2277_v33 }
  0x67   :  { %418 = vmatmul.f32.gmra.mxu1 %v2277_v33 }
  0x6e   :  { %371 = vmatmul.f32.gmra.mxu0 %v112_v40 }
  0x6f   :  { %422 = vmatmul.f32.gmra.mxu1 %v112_v40 }
  0x76   :  { %375 = vmatmul.f32.gmra.mxu0 %v120_v47 }
  0x77   :  { %426 = vmatmul.f32.gmra.mxu1 %v120_v47 }
  0x7e   :  { %379 = vmatmul.f32.gmra.mxu0 %v128_v54 }
  0x7f   :  { %430 = vmatmul.f32.gmra.mxu1 %v128_v54  ;;  %v442_v54 = vlaneseq }
  0x81   :  { %v443_v59 = vand.u32 127, %v442_v54 }
  0x83   :  { %vm444_vm1 = vcmp.ge.s32.totalorder %v443_v59, 64  ;;  %vm445_vm2 = vcmp.lt.s32.totalorder %v443_v59, 96 }
  0x84   :  { %vm446_vm3 = vmand %vm444_vm1, %vm445_vm2 }
  0x86   :  { %383 = vmatmul.f32.gmra.mxu0 %v136_v61 }
  0x87   :  { %434 = vmatmul.f32.gmra.mxu1 %v136_v61 }
  0x8b   :  { %v86_v4 = vpop.f32.mrf.mxu0 }
  0x8c   :  { %v173_v5 = vpop.f32.mrf.mxu1  ;;  %v227_v6 = vpop.f32.mrf.mxu2  ;;  %v87_v51 = vadd.f32 %v2168_v8, %v86_v4  ;;  %v2206_v4 = vmov 0.5  }
  0x8d   :  { %v287_v7 = vpop.f32.mrf.mxu3 }
  0x8e   :  { %v174_v56 = vadd.f32 %v173_v5, %v87_v51 }
  0x90   :  { %v228_v62 = vadd.f32 %v227_v6, %v174_v56 }
  0x92   :  { %v288_v0 = vadd.f32 %v287_v7, %v228_v62 }
  0x93   :  { %v94_v9 = vpop.f32.mrf.mxu0 }
  0x94   :  { %v95_v10 = vadd.f32 %v2168_v8, %v94_v9  ;;  %v177_v11 = vpop.f32.mrf.mxu1  ;;  %v2310_v12 = vpop.f32.mrf.mxu2  ;;  %v2322_v9 = vsel %vm446_vm3, 1.0, %v2206_v4 }
  0x95   :  { %v2314_v14 = vpop.f32.mrf.mxu3 }
  0x96   :  { %v2312_v13 = vadd.f32 %v177_v11, %v95_v10 }
  0x9b   :  { %v102_v15 = vpop.f32.mrf.mxu0 }
  0x9c   :  { %v103_v16 = vadd.f32 %v2168_v8, %v102_v15  ;;  %v181_v17 = vpop.f32.mrf.mxu1  ;;  %v237_v18 = vpop.f32.mrf.mxu2  ;;  %v2329_v15 = vsel %vm446_vm3, 0.0, %v2206_v4 }
  0x9d   :  { %v299_v20 = vpop.f32.mrf.mxu3 }
  0x9e   :  { %v182_v19 = vadd.f32 %v181_v17, %v103_v16 }
  0xa0   :  { %v238_v21 = vadd.f32 %v237_v18, %v182_v19 }
  0xa2   :  { %v2316_v22 = vadd.f32 %v299_v20, %v238_v21 }
  0xa3   :  { %v110_v23 = vpop.f32.mrf.mxu0 }
  0xa4   :  { %v111_v24 = vadd.f32 %v2168_v8, %v110_v23  ;;  %v185_v25 = vpop.f32.mrf.mxu1  ;;  %v242_v26 = vpop.f32.mrf.mxu2 }
  0xa5   :  { %v305_v28 = vpop.f32.mrf.mxu3 }
  0xa6   :  { %v186_v27 = vadd.f32 %v185_v25, %v111_v24 }
  0xa8   :  { %v243_v29 = vadd.f32 %v242_v26, %v186_v27 }
  0xaa   :  { %v2318_v30 = vadd.f32 %v305_v28, %v243_v29 }
  0xab   :  { %v118_v31 = vpop.f32.mrf.mxu0 }
  0xac   :  { %v119_v32 = vadd.f32 %v2168_v8, %v118_v31  ;;  %v189_v33 = vpop.f32.mrf.mxu1  ;;  %v247_v34 = vpop.f32.mrf.mxu2 }
  0xad   :  { %v311_v36 = vpop.f32.mrf.mxu3 }
  0xae   :  { %v190_v35 = vadd.f32 %v189_v33, %v119_v32 }
  0xb0   :  { %v248_v37 = vadd.f32 %v247_v34, %v190_v35 }
  0xb2   :  { %v312_v38 = vadd.f32 %v311_v36, %v248_v37 }
  0xb3   :  { %v126_v39 = vpop.f32.mrf.mxu0 }
  0xb4   :  { %v127_v40 = vadd.f32 %v2168_v8, %v126_v39  ;;  %v193_v41 = vpop.f32.mrf.mxu1  ;;  %v252_v42 = vpop.f32.mrf.mxu2  ;;  %v440_v39 = vld [vmem:[%s2707_s2 + $0x10] sm:$0xff] }
  0xb5   :  { %v317_v44 = vpop.f32.mrf.mxu3 }
  0xb6   :  { %v194_v43 = vadd.f32 %v193_v41, %v127_v40  ;;  %v439_v40 = vld [vmem:[%s2707_s2 + $0x8] sm:$0xff] }
  0xb8   :  { %v253_v45 = vadd.f32 %v252_v42, %v194_v43  ;;  %v2364_v42 = vand.u32 4294901760, %v440_v39  ;;  %v2366_v43 = vand.u32 4294901760, %v439_v40 }
  0xba   :  { %v318_v46 = vadd.f32 %v317_v44, %v253_v45  ;;  %v438_v44 = vld [vmem:[%s2707_s2] sm:$0xff] }
  0xbb   :  { %v134_v47 = vpop.f32.mrf.mxu0  ;;  %v2371_v45 = vand.u32 4294901760, %v438_v44 }
  0xbc   :  { %v135_v48 = vadd.f32 %v2168_v8, %v134_v47  ;;  %v197_v49 = vpop.f32.mrf.mxu1  ;;  %v257_v50 = vpop.f32.mrf.mxu2  ;;  %v2378_v47 = vsub.f32 %v440_v39, %v2364_v42 }
  0xbd   :  { %v323_v53 = vpop.f32.mrf.mxu3 }
  0xbe   :  { %v198_v52 = vadd.f32 %v197_v49, %v135_v48  ;;  %v2381_v48 = vsub.f32 %v439_v40, %v2366_v43  ;;  %v2385_v49 = vsub.f32 %v438_v44, %v2371_v45  ;;  %v2392_v51 = vand.u32 4294901760, %v2378_v47 }
  0xc0   :  { %v258_v55 = vadd.f32 %v257_v50, %v198_v52  ;;  %v2395_v52 = vand.u32 4294901760, %v2381_v48 }
  0xc2   :  { %v324_v57 = vadd.f32 %v323_v53, %v258_v55  ;;  %v2399_v53 = vand.u32 4294901760, %v2385_v49  ;;  %v520_v55 = vsub.f32 %v2378_v47, %v2392_v51  ;;  %v526_v56 = vsub.f32 %v2381_v48, %v2395_v52 }
  0xc3   :  { %v142_v58 = vpop.f32.mrf.mxu0 }
  0xc4   :  { %v143_v60 = vadd.f32 %v2168_v8, %v142_v58  ;;  %v201_v61 = vpop.f32.mrf.mxu1  ;;  %v2412_v58 = vand.u32 4294901760, %v520_v55  ;;  %v532_v59 = vsub.f32 %v2385_v49, %v2399_v53 }
  0xc6   :  { %v2320_v63 = vadd.f32 %v201_v61, %v143_v60  ;;  %v2421_v60 = vand.u32 4294901760, %v526_v56  ;;  %v2427_v61 = vand.u32 4294901760, %v532_v59 }
  0xcb   :  { %v356_v1 = vpop.f32.mrf.mxu0 }
  0xcc   :  { %v357_v2 = vadd.f32 %v356_v1, %v288_v0  ;;  %v407_v3 = vpop.f32.mrf.mxu1 }
  0xce   :  { %v408_v10 = vadd.f32 %v407_v3, %v357_v2 }
  0xd0   :  { %v449_v5 = vmul.f32 %v2322_v9, %v408_v10 }
  0xd2   :  { %2170 = vtanh.f32 %v449_v5 }
  0xd3   :  { %v2325_v11 = vpop.f32.mrf.mxu0 }
  0xd4   :  { %v2327_v8 = vpop.f32.mrf.mxu1 }
  0xd8   :  { %v2171_v6 = vpop.eup %2170 }
  0xd9   :  { %v451_v7 = vmul.f32 %v2171_v6, %v2322_v9 }
  0xdb   :  { %v2332_v16 = vpop.f32.mrf.mxu0  ;;  %v2335_v17 = vadd.f32 %v451_v7, %v2329_v15  ;;  %v2472_v7 = vpop.f32.mrf.mxu3 }
  0xdc   :  { %v2337_v18 = vpop.f32.mrf.mxu1 }
  0xdd   :  { %454 = vrot.lane.b32.xlu0 %v2335_v17, %s2207_s3 }
  0xe3   :  { %v2341_v19 = vpop.f32.mrf.mxu0 }
  0xe4   :  { %v2343_v20 = vpop.f32.mrf.mxu1 }
  0xeb   :  { %v372_v21 = vpop.f32.mrf.mxu0 }
  0xec   :  { %v373_v23 = vadd.f32 %v372_v21, %v312_v38  ;;  %v423_v24 = vpop.f32.mrf.mxu1  ;;  %v441_v38 = vld [vmem:[%s2707_s2 + $0x18] sm:$0xff]  ;;  %v233_v21 = vadd.f32 %v2310_v12, %v2312_v13 }
  0xed   :  { %v2362_v41 = vand.u32 4294901760, %v441_v38 }
  0xee   :  { %v2345_v25 = vadd.f32 %v423_v24, %v373_v23  ;;  %v294_v23 = vadd.f32 %v2314_v14, %v233_v21 }
  0xef   :  { %483 = vmatpush.msrb.mxu2 %v2362_v41  ;;  %1069 = vmatpush.msra.mxu1 %v2362_v41 }
  0xf1   :  { %485 = vmatpush.msrb.mxu2 %v2364_v42  ;;  %1071 = vmatpush.msra.mxu1 %v2364_v42 }
  0xf3   :  { %v376_v26 = vpop.f32.mrf.mxu0  ;;  %487 = vmatpush.msrb.mxu2 %v2366_v43  ;;  %1073 = vmatpush.msra.mxu1 %v2366_v43 }
  0xf4   :  { %v377_v27 = vadd.f32 %v376_v26, %v318_v46  ;;  %v427_v28 = vpop.f32.mrf.mxu1  ;;  %v2375_v46 = vsub.f32 %v441_v38, %v2362_v41  ;;  %v361_v26 = vadd.f32 %v2325_v11, %v294_v23 }
  0xf5   :  { %489 = vmatpush.msrb.mxu2 %v2371_v45  ;;  %1075 = vmatpush.msra.mxu1 %v2371_v45 }
  0xf6   :  { %v2347_v29 = vadd.f32 %v427_v28, %v377_v27  ;;  %v2388_v50 = vand.u32 4294901760, %v2375_v46  ;;  %v412_v28 = vadd.f32 %v2327_v8, %v361_v26  ;;  %v365_v26 = vadd.f32 %v2332_v16, %v2316_v22 }
  0xf7   :  { %554 = vmatpush.msra.mxu2 %v2375_v46  ;;  %1220 = vmatpush.msrb.mxu1 %v2362_v41 }
  0xf8   :  { %v514_v54 = vsub.f32 %v2375_v46, %v2388_v50  ;;  %1038 = vmatpush.msra.mxu0 %v2388_v50 }
  0xf9   :  { %557 = vmatpush.msra.mxu2 %v2378_v47  ;;  %1222 = vmatpush.msrb.mxu1 %v2364_v42 }
  0xfa   :  { %1042 = vmatpush.msra.mxu0 %v2392_v51 }
  0xfb   :  { %v380_v31 = vpop.f32.mrf.mxu0  ;;  %560 = vmatpush.msra.mxu2 %v2381_v48  ;;  %1224 = vmatpush.msrb.mxu1 %v2366_v43 }
  0xfc   :  { %v381_v32 = vadd.f32 %v380_v31, %v324_v57  ;;  %v431_v33 = vpop.f32.mrf.mxu1  ;;  %v2410_v57 = vand.u32 4294901760, %v514_v54  ;;  %1046 = vmatpush.msra.mxu0 %v2395_v52 }
  0xfd   :  { %563 = vmatpush.msra.mxu2 %v2385_v49  ;;  %1226 = vmatpush.msrb.mxu1 %v2371_v45 }
  0xfe   :  { %v2349_v34 = vadd.f32 %v431_v33, %v381_v32  ;;  %516 = vmatpush.msrb.mxu3 %v2410_v57  ;;  %1050 = vmatpush.msra.mxu0 %v2399_v53 }
 0x100   :  { %522 = vmatpush.msrb.mxu3 %v2412_v58  ;;  %1191 = vmatpush.msrb.mxu0 %v2375_v46 }
 0x102   :  { %528 = vmatpush.msrb.mxu3 %v2421_v60  ;;  %1194 = vmatpush.msrb.mxu0 %v2378_v47 }
 0x104   :  { %534 = vmatpush.msrb.mxu3 %v2427_v61  ;;  %1197 = vmatpush.msrb.mxu0 %v2381_v48 }
 0x106   :  { %583 = vmatpush.msra.mxu3 %v2362_v41  ;;  %1200 = vmatpush.msrb.mxu0 %v2385_v49 }
 0x108   :  { %585 = vmatpush.msra.mxu3 %v2364_v42 }
 0x10a   :  { %587 = vmatpush.msra.mxu3 %v2366_v43 }
 0x10c   :  { %589 = vmatpush.msra.mxu3 %v2371_v45 }
 0x14f   :  { %v455_v35 = vpop.permute.xlu0 %454 }
 0x150   :  { %v457_v36 = vmul.f32 %v455_v35, %v2335_v17 }
 0x152   :  { %2172 = vtanh.f32 %v457_v36  ;;  %660 = vrot.lane.b32.xlu2 %v457_v36, %s2208_s17 }
 0x158   :  { %v2173_v37 = vpop.eup %2172 }
 0x159   :  { %460 = vrot.lane.b32.xlu0 %v2173_v37, %s2209_s18 }
 0x1ac   :  { %v661_v55 = vpop.permute.xlu2 %660 }
 0x1cb   :  { %v461_v62 = vpop.permute.xlu0 %460 }
 0x1cc   :  { %v463_v0 = vmul.f32 %v461_v62, %v2335_v17  ;;  %v2474_v17 = vpop.f32.mrf.mxu2 }
 0x1ce   :  { %465 = vrot.lane.b32.xlu1 %v463_v0, %s2208_s17 }
 0x240   :  { %v466_v1 = vpop.permute.xlu1 %465 }
 0x241   :  { %v468_v2 = vsel %vm467_vm4, %v466_v1, 0 }
 0x242   :  { %v490_v3 = vand.u32 4294901760, %v468_v2 }
 0x244   :  { %v491_v4 = vsub.f32 %v468_v2, %v490_v3  ;;  %536 = vmatmul.f32.vlgmr.msrb.gmra.mxu3 %v490_v3 }
 0x245   :  { %643 = vmatpush.msrb.mxu3 %v2362_v41 }
 0x246   :  { %v492_v10 = vand.u32 4294901760, %v491_v4 }
 0x247   :  { %645 = vmatpush.msrb.mxu3 %v2364_v42 }
 0x248   :  { %v493_v5 = vsub.f32 %v491_v4, %v492_v10 }
 0x249   :  { %647 = vmatpush.msrb.mxu3 %v2366_v43 }
 0x24a   :  { %v494_v6 = vand.u32 4294901760, %v493_v5 }
 0x24b   :  { %649 = vmatpush.msrb.mxu3 %v2371_v45 }
 0x24c   :  { %495 = vmatmul.f32.vlgmr.msrb.gmra.mxu2 %v494_v6  ;;  %593 = vmatmul.f32.vlgmr.msra.gmra.mxu3 %v492_v10 }
 0x24d   :  { %612 = vmatpush.msrb.mxu2 %v2388_v50  ;;  %731 = vmatpush.msra.mxu3 %v2410_v57 }
 0x24f   :  { %616 = vmatpush.msrb.mxu2 %v2392_v51  ;;  %737 = vmatpush.msra.mxu3 %v2412_v58 }
 0x251   :  { %620 = vmatpush.msrb.mxu2 %v2395_v52  ;;  %743 = vmatpush.msra.mxu3 %v2421_v60 }
 0x253   :  { %624 = vmatpush.msrb.mxu2 %v2399_v53  ;;  %749 = vmatpush.msra.mxu3 %v2427_v61 }
 0x254   :  { %566 = vmatmul.f32.vlgmr.msra.gmra.mxu2 %v491_v4  ;;  %651 = vmatmul.f32.vlgmr.msrb.gmra.mxu3 %v490_v3 }
 0x255   :  { %698 = vmatpush.msra.mxu2 %v2362_v41  ;;  %798 = vmatpush.msrb.mxu3 %v2362_v41 }
 0x257   :  { %700 = vmatpush.msra.mxu2 %v2364_v42  ;;  %800 = vmatpush.msrb.mxu3 %v2364_v42 }
 0x259   :  { %702 = vmatpush.msra.mxu2 %v2366_v43  ;;  %802 = vmatpush.msrb.mxu3 %v2366_v43 }
 0x25b   :  { %704 = vmatpush.msra.mxu2 %v2371_v45  ;;  %804 = vmatpush.msrb.mxu3 %v2371_v45 }
 0x25c   :  { %626 = vmatmul.f32.vlgmr.msrb.gmra.mxu2 %v490_v3 }
 0x25d   :  { %769 = vmatpush.msrb.mxu2 %v2375_v46 }
 0x25f   :  { %772 = vmatpush.msrb.mxu2 %v2378_v47 }
 0x261   :  { %775 = vmatpush.msrb.mxu2 %v2381_v48 }
 0x263   :  { %778 = vmatpush.msrb.mxu2 %v2385_v49 }
 0x2c7   :  { %v537_v24 = vpop.f32.mrf.mxu3 }
 0x2cf   :  { %v496_v27 = vpop.f32.mrf.mxu2  ;;  %v594_v32 = vpop.f32.mrf.mxu3 }
 0x2d0   :  { %v497_v31 = vadd.f32 %v496_v27, %v412_v28  ;;  %v416_v28 = vadd.f32 %v2337_v18, %v365_v26  ;;  %v2558_v26 = vpop.f32.mrf.mxu0 }
 0x2d2   :  { %v538_v35 = vadd.f32 %v537_v24, %v497_v31 }
 0x2d7   :  { %v567_v33 = vpop.f32.mrf.mxu2  ;;  %v652_v40 = vpop.f32.mrf.mxu3 }
 0x2d8   :  { %v568_v36 = vadd.f32 %v567_v33, %v538_v35 }
 0x2da   :  { %v595_v37 = vadd.f32 %v594_v32, %v568_v36 }
 0x2df   :  { %v627_v38 = vpop.f32.mrf.mxu2 }
 0x2e0   :  { %v628_v39 = vadd.f32 %v627_v38, %v595_v37 }
 0x2e2   :  { %v653_v44 = vadd.f32 %v652_v40, %v628_v39 }
 0x2e4   :  { %v655_v12 = vmul.f32 %v653_v44, %v2322_v9 }
 0x2e6   :  { %2174 = vtanh.f32 %v655_v12 }
 0x2ec   :  { %v2175_v13 = vpop.eup %2174 }
 0x2ed   :  { %v657_v14 = vmul.f32 %v2175_v13, %v2322_v9 }
 0x2ef   :  { %v658_v11 = vadd.f32 %v657_v14, %v2329_v15 }
 0x2f1   :  { %665 = vrot.lane.b32.xlu1 %v658_v11, %s2207_s3  ;;  %v663_v56 = vmul.f32 %v661_v55, %v658_v11 }
 0x363   :  { %v666_v8 = vpop.permute.xlu1 %665 }
 0x364   :  { %v668_v54 = vmul.f32 %v666_v8, %v658_v11 }
 0x366   :  { %670 = vrot.lane.b32.xlu2 %v668_v54, %s2208_s17 }
 0x3c0   :  { %v671_v59 = vpop.permute.xlu2 %670 }
 0x3c1   :  { %v2486_v62 = vadd.f32 %v671_v59, %v663_v56 }
 0x3c3   :  { %2176 = vtanh.f32 %v2486_v62 }
 0x3c9   :  { %v2177_v0 = vpop.eup %2176 }
 0x3ca   :  { %676 = vrot.lane.b32.xlu0 %v2177_v0, %s2207_s3 }
 0x43c   :  { %v677_v1 = vpop.permute.xlu0 %676 }
 0x43d   :  { %v679_v2 = vmul.f32 %v677_v1, %v658_v11 }
 0x43f   :  { %681 = vrot.lane.b32.xlu1 %v679_v2, %s2208_s17 }
 0x4b1   :  { %v682_v3 = vpop.permute.xlu1 %681 }
 0x4b2   :  { %v683_v4 = vsel %vm467_vm4, %v682_v3, 0 }
 0x4b3   :  { %v705_v10 = vand.u32 4294901760, %v683_v4 }
 0x4b5   :  { %v706_v5 = vsub.f32 %v683_v4, %v705_v10  ;;  %751 = vmatmul.f32.vlgmr.msra.gmra.mxu3 %v705_v10 }
 0x4b6   :  { %858 = vmatpush.msra.mxu3 %v2362_v41 }
 0x4b7   :  { %v707_v6 = vand.u32 4294901760, %v706_v5 }
 0x4b8   :  { %860 = vmatpush.msra.mxu3 %v2364_v42 }
 0x4b9   :  { %v708_v21 = vsub.f32 %v706_v5, %v707_v6 }
 0x4ba   :  { %862 = vmatpush.msra.mxu3 %v2366_v43 }
 0x4bb   :  { %v709_v23 = vand.u32 4294901760, %v708_v21 }
 0x4bc   :  { %864 = vmatpush.msra.mxu3 %v2371_v45 }
 0x4bd   :  { %710 = vmatmul.f32.vlgmr.msra.gmra.mxu2 %v709_v23  ;;  %808 = vmatmul.f32.vlgmr.msrb.gmra.mxu3 %v707_v6 }
 0x4be   :  { %827 = vmatpush.msra.mxu2 %v2388_v50  ;;  %942 = vmatpush.msrb.mxu3 %v2410_v57 }
 0x4c0   :  { %831 = vmatpush.msra.mxu2 %v2392_v51  ;;  %948 = vmatpush.msrb.mxu3 %v2412_v58 }
 0x4c2   :  { %835 = vmatpush.msra.mxu2 %v2395_v52  ;;  %954 = vmatpush.msrb.mxu3 %v2421_v60 }
 0x4c4   :  { %839 = vmatpush.msra.mxu2 %v2399_v53  ;;  %960 = vmatpush.msrb.mxu3 %v2427_v61 }
 0x4c5   :  { %781 = vmatmul.f32.vlgmr.msrb.gmra.mxu2 %v706_v5  ;;  %866 = vmatmul.f32.vlgmr.msra.gmra.mxu3 %v705_v10  ;;  %v369_v5 = vadd.f32 %v2341_v19, %v2318_v30 }
 0x4c6   :  { %909 = vmatpush.msrb.mxu2 %v2362_v41  ;;  %1009 = vmatpush.msra.mxu3 %v2362_v41 }
 0x4c7   :  { %v420_v23 = vadd.f32 %v2343_v20, %v369_v5 }
 0x4c8   :  { %911 = vmatpush.msrb.mxu2 %v2364_v42  ;;  %1011 = vmatpush.msra.mxu3 %v2364_v42 }
 0x4ca   :  { %913 = vmatpush.msrb.mxu2 %v2366_v43  ;;  %1013 = vmatpush.msra.mxu3 %v2366_v43 }
 0x4cc   :  { %915 = vmatpush.msrb.mxu2 %v2371_v45  ;;  %1015 = vmatpush.msra.mxu3 %v2371_v45 }
 0x4cd   :  { %841 = vmatmul.f32.vlgmr.msra.gmra.mxu2 %v705_v10 }
 0x4ce   :  { %980 = vmatpush.msra.mxu2 %v2375_v46 }
 0x4d0   :  { %983 = vmatpush.msra.mxu2 %v2378_v47 }
 0x4d2   :  { %986 = vmatpush.msra.mxu2 %v2381_v48 }
 0x4d4   :  { %989 = vmatpush.msra.mxu2 %v2385_v49 }
 0x538   :  { %v752_v24 = vpop.f32.mrf.mxu3 }
 0x540   :  { %v711_v27 = vpop.f32.mrf.mxu2  ;;  %v809_v32 = vpop.f32.mrf.mxu3 }
 0x541   :  { %v712_v31 = vadd.f32 %v711_v27, %v416_v28  ;;  %v2560_v27 = vpop.f32.mrf.mxu1 }
 0x543   :  { %v753_v35 = vadd.f32 %v752_v24, %v712_v31 }
 0x548   :  { %v782_v33 = vpop.f32.mrf.mxu2  ;;  %v867_v40 = vpop.f32.mrf.mxu3 }
 0x549   :  { %v783_v36 = vadd.f32 %v782_v33, %v753_v35 }
 0x54b   :  { %v810_v37 = vadd.f32 %v809_v32, %v783_v36 }
 0x550   :  { %v842_v38 = vpop.f32.mrf.mxu2 }
 0x551   :  { %v843_v39 = vadd.f32 %v842_v38, %v810_v37 }
 0x553   :  { %v868_v44 = vadd.f32 %v867_v40, %v843_v39 }
 0x555   :  { %v870_v12 = vmul.f32 %v868_v44, %v2322_v9 }
 0x557   :  { %2178 = vtanh.f32 %v870_v12 }
 0x55d   :  { %v2179_v13 = vpop.eup %2178 }
 0x55e   :  { %v872_v14 = vmul.f32 %v2179_v13, %v2322_v9 }
 0x560   :  { %v873_v22 = vadd.f32 %v872_v14, %v2329_v15 }
 0x562   :  { %876 = vrot.lane.b32.xlu2 %v873_v22, %s2207_s3  ;;  %v874_v11 = vmul.f32 %v873_v22, %v2486_v62 }
 0x5bc   :  { %v877_v16 = vpop.permute.xlu2 %876 }
 0x5bd   :  { %v879_v18 = vmul.f32 %v877_v16, %v873_v22 }
 0x5bf   :  { %881 = vrot.lane.b32.xlu0 %v879_v18, %s2208_s17 }
 0x631   :  { %v882_v8 = vpop.permute.xlu0 %881 }
 0x632   :  { %v2525_v54 = vadd.f32 %v882_v8, %v874_v11 }
 0x634   :  { %2180 = vtanh.f32 %v2525_v54 }
 0x63a   :  { %v2181_v55 = vpop.eup %2180 }
 0x63b   :  { %887 = vrot.lane.b32.xlu1 %v2181_v55, %s2207_s3 }
 0x6ad   :  { %v888_v56 = vpop.permute.xlu1 %887 }
 0x6ae   :  { %v890_v59 = vmul.f32 %v888_v56, %v873_v22 }
 0x6b0   :  { %892 = vrot.lane.b32.xlu2 %v890_v59, %s2208_s17 }
 0x70a   :  { %v893_v0 = vpop.permute.xlu2 %892 }
 0x70b   :  { %v894_v1 = vsel %vm467_vm4, %v893_v0, 0 }
 0x70c   :  { %v916_v2 = vand.u32 4294901760, %v894_v1 }
 0x70e   :  { %v917_v3 = vsub.f32 %v894_v1, %v916_v2  ;;  %962 = vmatmul.f32.vlgmr.msrb.gmra.mxu3 %v916_v2  ;;  %1052 = vmatmul.f32.vlgmr.msra.gmra.mxu0 %v916_v2 }
 0x70f   :  { %1077 = vmatmul.f32.vlgmr.msra.gmra.mxu1 %v916_v2  ;;  %1153 = vmatpush.msrb.mxu3 %v2410_v57 }
 0x710   :  { %v918_v62 = vand.u32 4294901760, %v917_v3  ;;  %1364 = vmatpush.msra.mxu1 %v2410_v57  ;;  %1331 = vmatpush.msra.mxu0 %v2362_v41 }
 0x711   :  { %1159 = vmatpush.msrb.mxu3 %v2412_v58 }
 0x712   :  { %v919_v4 = vsub.f32 %v917_v3, %v918_v62  ;;  %1370 = vmatpush.msra.mxu1 %v2412_v58  ;;  %1333 = vmatpush.msra.mxu0 %v2364_v42 }
 0x713   :  { %1165 = vmatpush.msrb.mxu3 %v2421_v60 }
 0x714   :  { %v920_v10 = vand.u32 4294901760, %v919_v4  ;;  %1376 = vmatpush.msra.mxu1 %v2421_v60  ;;  %1335 = vmatpush.msra.mxu0 %v2366_v43 }
 0x715   :  { %1171 = vmatpush.msrb.mxu3 %v2427_v61 }
 0x716   :  { %921 = vmatmul.f32.vlgmr.msrb.gmra.mxu2 %v920_v10  ;;  %1019 = vmatmul.f32.vlgmr.msra.gmra.mxu3 %v918_v62 }
 0x717   :  { %1120 = vmatpush.msrb.mxu2 %v2362_v41  ;;  %1280 = vmatpush.msra.mxu3 %v2362_v41 }
 0x718   :  { %1382 = vmatpush.msra.mxu1 %v2427_v61  ;;  %1337 = vmatpush.msra.mxu0 %v2371_v45 }
 0x719   :  { %1122 = vmatpush.msrb.mxu2 %v2364_v42  ;;  %1282 = vmatpush.msra.mxu3 %v2364_v42 }
 0x71b   :  { %1124 = vmatpush.msrb.mxu2 %v2366_v43  ;;  %1284 = vmatpush.msra.mxu3 %v2366_v43 }
 0x71d   :  { %1126 = vmatpush.msrb.mxu2 %v2371_v45  ;;  %1286 = vmatpush.msra.mxu3 %v2371_v45 }
 0x71e   :  { %992 = vmatmul.f32.vlgmr.msra.gmra.mxu2 %v917_v3 }
 0x71f   :  { %1249 = vmatpush.msra.mxu2 %v2388_v50 }
 0x721   :  { %1253 = vmatpush.msra.mxu2 %v2392_v51 }
 0x723   :  { %1257 = vmatpush.msra.mxu2 %v2395_v52 }
 0x725   :  { %1261 = vmatpush.msra.mxu2 %v2399_v53 }
 0x78b   :  { %v1053_v36 = vpop.f32.mrf.mxu0 }
 0x78c   :  { %v1078_v38 = vpop.f32.mrf.mxu1 }
 0x791   :  { %v963_v6 = vpop.f32.mrf.mxu3 }
 0x799   :  { %v922_v21 = vpop.f32.mrf.mxu2  ;;  %v1020_v33 = vpop.f32.mrf.mxu3 }
 0x79a   :  { %v923_v24 = vadd.f32 %v922_v21, %v420_v23 }
 0x79c   :  { %v964_v28 = vadd.f32 %v963_v6, %v923_v24 }
 0x7a1   :  { %v993_v31 = vpop.f32.mrf.mxu2 }
 0x7a2   :  { %v994_v32 = vadd.f32 %v993_v31, %v964_v28 }
 0x7a4   :  { %v1021_v35 = vadd.f32 %v1020_v33, %v994_v32 }
 0x7a6   :  { %v1054_v37 = vadd.f32 %v1053_v36, %v1021_v35 }
 0x7a8   :  { %v1079_v39 = vadd.f32 %v1078_v38, %v1054_v37 }
 0x7aa   :  { %v1081_v30 = vmul.f32 %v1079_v39, %v2322_v9 }
 0x7ac   :  { %2182 = vtanh.f32 %v1081_v30 }
 0x7b2   :  { %v2183_v19 = vpop.eup %2182 }
 0x7b3   :  { %v1083_v20 = vmul.f32 %v2183_v19, %v2322_v9 }
 0x7b5   :  { %v1084_v40 = vadd.f32 %v1083_v20, %v2329_v15 }
 0x7b7   :  { %1087 = vrot.lane.b32.xlu0 %v1084_v40, %s2207_s3  ;;  %v1085_v13 = vmul.f32 %v1084_v40, %v2525_v54 }
 0x829   :  { %v1088_v44 = vpop.permute.xlu0 %1087 }
 0x82a   :  { %v1090_v12 = vmul.f32 %v1088_v44, %v1084_v40 }
 0x82c   :  { %1092 = vrot.lane.b32.xlu1 %v1090_v12, %s2208_s17 }
 0x89e   :  { %v1093_v14 = vpop.permute.xlu1 %1092 }
 0x89f   :  { %v2568_v22 = vadd.f32 %v1093_v14, %v1085_v13 }
 0x8a1   :  { %2184 = vtanh.f32 %v2568_v22 }
 0x8a7   :  { %v2185_v16 = vpop.eup %2184 }
 0x8a8   :  { %1098 = vrot.lane.b32.xlu2 %v2185_v16, %s2207_s3 }
 0x902   :  { %v1099_v18 = vpop.permute.xlu2 %1098 }
 0x903   :  { %v1101_v11 = vmul.f32 %v1099_v18, %v1084_v40 }
 0x905   :  { %1103 = vrot.lane.b32.xlu0 %v1101_v11, %s2208_s17 }
 0x977   :  { %v1104_v8 = vpop.permute.xlu0 %1103 }
 0x978   :  { %v1105_v55 = vsel %vm467_vm4, %v1104_v8, 0 }
 0x979   :  { %v1127_v56 = vand.u32 4294901760, %v1105_v55 }
 0x97b   :  { %v1128_v59 = vsub.f32 %v1105_v55, %v1127_v56  ;;  %1173 = vmatmul.f32.vlgmr.msrb.gmra.mxu3 %v1127_v56 }
 0x97c   :  { %1431 = vmatpush.msrb.mxu3 %v2362_v41 }
 0x97d   :  { %v1129_v54 = vand.u32 4294901760, %v1128_v59  ;;  %1203 = vmatmul.f32.vlgmr.msrb.gmra.mxu0 %v1128_v59 }
 0x97e   :  { %1433 = vmatpush.msrb.mxu3 %v2364_v42  ;;  %1460 = vmatpush.msrb.mxu0 %v2388_v50 }
 0x97f   :  { %v1130_v0 = vsub.f32 %v1128_v59, %v1129_v54  ;;  %1230 = vmatmul.f32.vlgmr.msrb.gmra.mxu1 %v1129_v54 }
 0x980   :  { %1435 = vmatpush.msrb.mxu3 %v2366_v43  ;;  %1491 = vmatpush.msrb.mxu1 %v2362_v41 }
 0x981   :  { %v1131_v1 = vand.u32 4294901760, %v1130_v0  ;;  %1464 = vmatpush.msrb.mxu0 %v2392_v51 }
 0x982   :  { %1437 = vmatpush.msrb.mxu3 %v2371_v45  ;;  %1493 = vmatpush.msrb.mxu1 %v2364_v42 }
 0x983   :  { %1132 = vmatmul.f32.vlgmr.msrb.gmra.mxu2 %v1131_v1  ;;  %1288 = vmatmul.f32.vlgmr.msra.gmra.mxu3 %v1127_v56 }
 0x984   :  { %1402 = vmatpush.msrb.mxu2 %v2375_v46  ;;  %1495 = vmatpush.msrb.mxu1 %v2366_v43 }
 0x985   :  { %1468 = vmatpush.msrb.mxu0 %v2395_v52  ;;  %1575 = vmatpush.msra.mxu3 %v2410_v57 }
 0x986   :  { %1405 = vmatpush.msrb.mxu2 %v2378_v47  ;;  %1497 = vmatpush.msrb.mxu1 %v2371_v45 }
 0x987   :  { %1472 = vmatpush.msrb.mxu0 %v2399_v53  ;;  %1581 = vmatpush.msra.mxu3 %v2412_v58 }
 0x988   :  { %1408 = vmatpush.msrb.mxu2 %v2381_v48 }
 0x989   :  { %1587 = vmatpush.msra.mxu3 %v2421_v60 }
 0x98a   :  { %1411 = vmatpush.msrb.mxu2 %v2385_v49 }
 0x98b   :  { %1263 = vmatmul.f32.vlgmr.msra.gmra.mxu2 %v1127_v56  ;;  %1593 = vmatpush.msra.mxu3 %v2427_v61 }
 0x98c   :  { %1542 = vmatpush.msra.mxu2 %v2362_v41 }
 0x98e   :  { %1544 = vmatpush.msra.mxu2 %v2364_v42 }
 0x990   :  { %1546 = vmatpush.msra.mxu2 %v2366_v43 }
 0x992   :  { %1548 = vmatpush.msra.mxu2 %v2371_v45 }
 0x9fa   :  { %v1204_v10 = vpop.f32.mrf.mxu0 }
 0x9fc   :  { %v1231_v6 = vpop.f32.mrf.mxu1 }
 0x9fe   :  { %v1174_v2 = vpop.f32.mrf.mxu3 }
 0xa06   :  { %v1133_v3 = vpop.f32.mrf.mxu2  ;;  %v1289_v28 = vpop.f32.mrf.mxu3 }
 0xa07   :  { %v1134_v62 = vadd.f32 %v1133_v3, %v2345_v25 }
 0xa09   :  { %v1175_v4 = vadd.f32 %v1174_v2, %v1134_v62 }
 0xa0b   :  { %v1205_v5 = vadd.f32 %v1204_v10, %v1175_v4 }
 0xa0d   :  { %v1232_v21 = vadd.f32 %v1231_v6, %v1205_v5 }
 0xa0e   :  { %v1264_v23 = vpop.f32.mrf.mxu2 }
 0xa0f   :  { %v1265_v24 = vadd.f32 %v1264_v23, %v1232_v21 }
 0xa11   :  { %v1290_v31 = vadd.f32 %v1289_v28, %v1265_v24 }
 0xa13   :  { %v1292_v32 = vmul.f32 %v1290_v31, %v2322_v9 }
 0xa15   :  { %2186 = vtanh.f32 %v1292_v32 }
 0xa1b   :  { %v2187_v33 = vpop.eup %2186 }
 0xa1c   :  { %v1294_v35 = vmul.f32 %v2187_v33, %v2322_v9 }
 0xa1e   :  { %v1295_v36 = vadd.f32 %v1294_v35, %v2329_v15 }
 0xa20   :  { %1298 = vrot.lane.b32.xlu1 %v1295_v36, %s2207_s3  ;;  %v1296_v38 = vmul.f32 %v1295_v36, %v2568_v22 }
 0xa92   :  { %v1299_v25 = vpop.permute.xlu1 %1298 }
 0xa93   :  { %v1301_v37 = vmul.f32 %v1299_v25, %v1295_v36 }
 0xa95   :  { %1303 = vrot.lane.b32.xlu2 %v1301_v37, %s2208_s17 }
 0xaef   :  { %v1304_v39 = vpop.permute.xlu2 %1303 }
 0xaf0   :  { %v2605_v30 = vadd.f32 %v1304_v39, %v1296_v38 }
 0xaf2   :  { %2188 = vtanh.f32 %v2605_v30 }
 0xaf8   :  { %v2189_v19 = vpop.eup %2188 }
 0xaf9   :  { %1309 = vrot.lane.b32.xlu0 %v2189_v19, %s2207_s3 }
 0xb6b   :  { %v1310_v20 = vpop.permute.xlu0 %1309 }
 0xb6c   :  { %v1312_v40 = vmul.f32 %v1310_v20, %v1295_v36 }
 0xb6e   :  { %1314 = vrot.lane.b32.xlu1 %v1312_v40, %s2208_s17 }
 0xbe0   :  { %v1315_v44 = vpop.permute.xlu1 %1314 }
 0xbe1   :  { %v1316_v12 = vsel %vm467_vm4, %v1315_v44, 0 }
 0xbe2   :  { %v1338_v13 = vand.u32 4294901760, %v1316_v12 }
 0xbe4   :  { %v1339_v14 = vsub.f32 %v1316_v12, %v1338_v13  ;;  %1384 = vmatmul.f32.vlgmr.msra.gmra.mxu1 %v1338_v13 }
 0xbe5   :  { %1642 = vmatpush.msra.mxu1 %v2362_v41 }
 0xbe6   :  { %v1340_v22 = vand.u32 4294901760, %v1339_v14  ;;  %1414 = vmatmul.f32.vlgmr.msrb.gmra.mxu2 %v1339_v14 }
 0xbe7   :  { %1644 = vmatpush.msra.mxu1 %v2364_v42  ;;  %1671 = vmatpush.msrb.mxu2 %v2388_v50 }
 0xbe8   :  { %v1341_v16 = vsub.f32 %v1339_v14, %v1340_v22  ;;  %1441 = vmatmul.f32.vlgmr.msrb.gmra.mxu3 %v1340_v22 }
 0xbe9   :  { %1646 = vmatpush.msra.mxu1 %v2366_v43  ;;  %1702 = vmatpush.msrb.mxu3 %v2362_v41 }
 0xbea   :  { %v1342_v18 = vand.u32 4294901760, %v1341_v16  ;;  %1675 = vmatpush.msrb.mxu2 %v2392_v51 }
 0xbeb   :  { %1648 = vmatpush.msra.mxu1 %v2371_v45  ;;  %1704 = vmatpush.msrb.mxu3 %v2364_v42 }
 0xbec   :  { %1343 = vmatmul.f32.vlgmr.msra.gmra.mxu0 %v1342_v18  ;;  %1499 = vmatmul.f32.vlgmr.msrb.gmra.mxu1 %v1338_v13 }
 0xbed   :  { %1613 = vmatpush.msra.mxu0 %v2375_v46  ;;  %1706 = vmatpush.msrb.mxu3 %v2366_v43 }
 0xbee   :  { %1679 = vmatpush.msrb.mxu2 %v2395_v52  ;;  %1786 = vmatpush.msrb.mxu1 %v2410_v57 }
 0xbef   :  { %1616 = vmatpush.msra.mxu0 %v2378_v47  ;;  %1708 = vmatpush.msrb.mxu3 %v2371_v45 }
 0xbf0   :  { %1683 = vmatpush.msrb.mxu2 %v2399_v53  ;;  %1792 = vmatpush.msrb.mxu1 %v2412_v58 }
 0xbf1   :  { %1619 = vmatpush.msra.mxu0 %v2381_v48 }
 0xbf2   :  { %1798 = vmatpush.msrb.mxu1 %v2421_v60 }
 0xbf3   :  { %1622 = vmatpush.msra.mxu0 %v2385_v49 }
 0xbf4   :  { %1474 = vmatmul.f32.vlgmr.msrb.gmra.mxu0 %v1338_v13  ;;  %1804 = vmatpush.msrb.mxu1 %v2427_v61 }
 0xbf5   :  { %1753 = vmatpush.msrb.mxu0 %v2362_v41 }
 0xbf7   :  { %1755 = vmatpush.msrb.mxu0 %v2364_v42 }
 0xbf9   :  { %1757 = vmatpush.msrb.mxu0 %v2366_v43 }
 0xbfb   :  { %1759 = vmatpush.msrb.mxu0 %v2371_v45 }
 0xc61   :  { %v1385_v57 = vpop.f32.mrf.mxu1 }
 0xc69   :  { %v1344_v11 = vpop.f32.mrf.mxu0  ;;  %v1415_v55 = vpop.f32.mrf.mxu2 }
 0xc6a   :  { %v1345_v58 = vadd.f32 %v1344_v11, %v2347_v29  ;;  %v1500_v61 = vpop.f32.mrf.mxu1 }
 0xc6b   :  { %v1442_v56 = vpop.f32.mrf.mxu3 }
 0xc6c   :  { %v1386_v8 = vadd.f32 %v1385_v57, %v1345_v58 }
 0xc6e   :  { %v1416_v60 = vadd.f32 %v1415_v55, %v1386_v8 }
 0xc70   :  { %v1443_v59 = vadd.f32 %v1442_v56, %v1416_v60  ;;  %v263_v60 = vadd.f32 %v2474_v17, %v2320_v63 }
 0xc71   :  { %v1475_v54 = vpop.f32.mrf.mxu0 }
 0xc72   :  { %v1476_v0 = vadd.f32 %v1475_v54, %v1443_v59  ;;  %v330_v56 = vadd.f32 %v2472_v7, %v263_v60 }
 0xc74   :  { %v1501_v1 = vadd.f32 %v1500_v61, %v1476_v0  ;;  %v385_v59 = vadd.f32 %v2558_v26, %v330_v56 }
 0xc76   :  { %v1503_v2 = vmul.f32 %v1501_v1, %v2322_v9  ;;  %v436_v54 = vadd.f32 %v2560_v27, %v385_v59 }
 0xc78   :  { %2190 = vtanh.f32 %v1503_v2 }
 0xc7e   :  { %v2191_v3 = vpop.eup %2190 }
 0xc7f   :  { %v1505_v62 = vmul.f32 %v2191_v3, %v2322_v9 }
 0xc81   :  { %v1506_v4 = vadd.f32 %v1505_v62, %v2329_v15 }
 0xc83   :  { %1509 = vrot.lane.b32.xlu2 %v1506_v4, %s2207_s3  ;;  %v1507_v5 = vmul.f32 %v1506_v4, %v2605_v30 }
 0xcdd   :  { %v1510_v29 = vpop.permute.xlu2 %1509 }
 0xcde   :  { %v1512_v10 = vmul.f32 %v1510_v29, %v1506_v4 }
 0xce0   :  { %1514 = vrot.lane.b32.xlu0 %v1512_v10, %s2208_s17 }
 0xd52   :  { %v1515_v6 = vpop.permute.xlu0 %1514 }
 0xd53   :  { %v1517_v21 = vadd.f32 %v1515_v6, %v1507_v5 }
 0xd55   :  { %2192 = vtanh.f32 %v1517_v21 }
 0xd5b   :  { %v2193_v23 = vpop.eup %2192 }
 0xd5c   :  { %1520 = vrot.lane.b32.xlu1 %v2193_v23, %s2207_s3 }
 0xdce   :  { %v1521_v24 = vpop.permute.xlu1 %1520 }
 0xdcf   :  { %v1523_v28 = vmul.f32 %v1521_v24, %v1506_v4 }
 0xdd1   :  { %1525 = vrot.lane.b32.xlu2 %v1523_v28, %s2208_s17 }
 0xe2b   :  { %v1526_v31 = vpop.permute.xlu2 %1525 }
 0xe2c   :  { %v1527_v32 = vsel %vm467_vm4, %v1526_v31, 0 }
 0xe2d   :  { %v1549_v33 = vand.u32 4294901760, %v1527_v32 }
 0xe2f   :  { %v1550_v35 = vsub.f32 %v1527_v32, %v1549_v33  ;;  %1595 = vmatmul.f32.vlgmr.msra.gmra.mxu3 %v1549_v33 }
 0xe30   :  { %1853 = vmatpush.msra.mxu3 %v2362_v41 }
 0xe31   :  { %v1551_v36 = vand.u32 4294901760, %v1550_v35  ;;  %1625 = vmatmul.f32.vlgmr.msra.gmra.mxu0 %v1550_v35 }
 0xe32   :  { %1855 = vmatpush.msra.mxu3 %v2364_v42  ;;  %1882 = vmatpush.msra.mxu0 %v2388_v50 }
 0xe33   :  { %v1552_v25 = vsub.f32 %v1550_v35, %v1551_v36  ;;  %1652 = vmatmul.f32.vlgmr.msra.gmra.mxu1 %v1551_v36 }
 0xe34   :  { %1857 = vmatpush.msra.mxu3 %v2366_v43  ;;  %1913 = vmatpush.msra.mxu1 %v2362_v41 }
 0xe35   :  { %v1553_v37 = vand.u32 4294901760, %v1552_v25  ;;  %1886 = vmatpush.msra.mxu0 %v2392_v51 }
 0xe36   :  { %1859 = vmatpush.msra.mxu3 %v2371_v45  ;;  %1915 = vmatpush.msra.mxu1 %v2364_v42 }
 0xe37   :  { %1554 = vmatmul.f32.vlgmr.msra.gmra.mxu2 %v1553_v37  ;;  %1710 = vmatmul.f32.vlgmr.msrb.gmra.mxu3 %v1549_v33 }
 0xe38   :  { %1824 = vmatpush.msra.mxu2 %v2375_v46  ;;  %1917 = vmatpush.msra.mxu1 %v2366_v43 }
 0xe39   :  { %1890 = vmatpush.msra.mxu0 %v2395_v52 }
 0xe3a   :  { %1827 = vmatpush.msra.mxu2 %v2378_v47  ;;  %1919 = vmatpush.msra.mxu1 %v2371_v45 }
 0xe3b   :  { %1894 = vmatpush.msra.mxu0 %v2399_v53 }
 0xe3c   :  { %1830 = vmatpush.msra.mxu2 %v2381_v48 }
 0xe3e   :  { %1833 = vmatpush.msra.mxu2 %v2385_v49 }
 0xe3f   :  { %1685 = vmatmul.f32.vlgmr.msrb.gmra.mxu2 %v1549_v33  ;;  %v1949_v33 = vld [vmem:[%s2708_s4 + $0x18] sm:$0xff] }
 0xeae   :  { %v1626_v51 = vpop.f32.mrf.mxu0 }
 0xeb0   :  { %v1653_v38 = vpop.f32.mrf.mxu1 }
 0xeb2   :  { %v1596_v41 = vpop.f32.mrf.mxu3 }
 0xeba   :  { %v1555_v42 = vpop.f32.mrf.mxu2  ;;  %v1711_v30 = vpop.f32.mrf.mxu3 }
 0xebb   :  { %v1556_v50 = vadd.f32 %v1555_v42, %v2349_v34 }
 0xebd   :  { %v1597_v46 = vadd.f32 %v1596_v41, %v1556_v50 }
 0xebf   :  { %v1627_v43 = vadd.f32 %v1626_v51, %v1597_v46 }
 0xec1   :  { %v1654_v52 = vadd.f32 %v1653_v38, %v1627_v43 }
 0xec2   :  { %v1686_v39 = vpop.f32.mrf.mxu2 }
 0xec3   :  { %v1687_v47 = vadd.f32 %v1686_v39, %v1654_v52  ;;  %v1947_v52 = vld [vmem:[%s2708_s4 + $0x8] sm:$0xff] }
 0xec4   :  { %v1975_v39 = vand.u32 4294901760, %v1947_v52 }
 0xec5   :  { %v1712_v45 = vadd.f32 %v1711_v30, %v1687_v47  ;;  %v1946_v47 = vld [vmem:[%s2708_s4] sm:$0xff] }
 0xec6   :  { %v2013_v30 = vsub.f32 %v1947_v52, %v1975_v39 }
 0xec7   :  { %v1714_v53 = vmul.f32 %v1712_v45, %v2322_v9  ;;  %v1977_v45 = vand.u32 4294901760, %v1946_v47 }
 0xec9   :  { %2194 = vtanh.f32 %v1714_v53  ;;  %v2014_v53 = vand.u32 4294901760, %v2013_v30 }
 0xecf   :  { %v2195_v48 = vpop.eup %2194 }
 0xed0   :  { %v1716_v49 = vmul.f32 %v2195_v48, %v2322_v9  ;;  %v2019_v48 = vsub.f32 %v1946_v47, %v1977_v45 }
 0xed2   :  { %v1717_v19 = vadd.f32 %v1716_v49, %v2329_v15  ;;  %v2015_v49 = vsub.f32 %v2013_v30, %v2014_v53 }
 0xed4   :  { %1720 = vrot.lane.b32.xlu0 %v1717_v19, %s2207_s3  ;;  %v1718_v40 = vmul.f32 %v1717_v19, %v1517_v21 }
 0xf46   :  { %v1721_v34 = vpop.permute.xlu0 %1720 }
 0xf47   :  { %v1723_v20 = vmul.f32 %v1721_v34, %v1717_v19  ;;  %v2016_v34 = vand.u32 4294901760, %v2015_v49 }
 0xf49   :  { %1725 = vrot.lane.b32.xlu1 %v1723_v20, %s2208_s17 }
 0xfbb   :  { %v1726_v44 = vpop.permute.xlu1 %1725 }
 0xfbc   :  { %v1728_v12 = vadd.f32 %v1726_v44, %v1718_v40 }
 0xfbe   :  { %2196 = vtanh.f32 %v1728_v12 }
 0xfc4   :  { %v2197_v13 = vpop.eup %2196 }
 0xfc5   :  { %1731 = vrot.lane.b32.xlu2 %v2197_v13, %s2207_s3 }
0x101f   :  { %v1732_v14 = vpop.permute.xlu2 %1731 }
0x1020   :  { %v1734_v22 = vmul.f32 %v1732_v14, %v1717_v19  ;;  %v2020_v19 = vand.u32 4294901760, %v2019_v48 }
0x1022   :  { %1736 = vrot.lane.b32.xlu0 %v1734_v22, %s2208_s17  ;;  %v2021_v20 = vsub.f32 %v2019_v48, %v2020_v19 }
0x1024   :  { %v2022_v40 = vand.u32 4294901760, %v2021_v20 }
0x1094   :  { %v1737_v16 = vpop.permute.xlu0 %1736 }
0x1095   :  { %v1738_v18 = vsel %vm467_vm4, %v1737_v16, 0 }
0x1096   :  { %v1760_v57 = vand.u32 4294901760, %v1738_v18 }
0x1098   :  { %v1761_v11 = vsub.f32 %v1738_v18, %v1760_v57  ;;  %1806 = vmatmul.f32.vlgmr.msrb.gmra.mxu1 %v1760_v57 }
0x109a   :  { %v1762_v58 = vand.u32 4294901760, %v1761_v11  ;;  %1836 = vmatmul.f32.vlgmr.msra.gmra.mxu2 %v1761_v11 }
0x109c   :  { %v1763_v8 = vsub.f32 %v1761_v11, %v1762_v58  ;;  %1863 = vmatmul.f32.vlgmr.msra.gmra.mxu3 %v1762_v58 }
0x109e   :  { %v1764_v55 = vand.u32 4294901760, %v1763_v8 }
0x10a0   :  { %1765 = vmatmul.f32.vlgmr.msrb.gmra.mxu0 %v1764_v55  ;;  %1921 = vmatmul.f32.vlgmr.msra.gmra.mxu1 %v1760_v57 }
0x10a8   :  { %1896 = vmatmul.f32.vlgmr.msra.gmra.mxu0 %v1760_v57  ;;  %v2169_v57 = vld [vmem:[%s2709_s5] ss:$0 sm:$0xff] }
0x1115   :  { %v1807_v0 = vpop.f32.mrf.mxu1 }
0x111d   :  { %v1766_v61 = vpop.f32.mrf.mxu0  ;;  %v1837_v3 = vpop.f32.mrf.mxu2 }
0x111e   :  { %v1767_v1 = vadd.f32 %v1766_v61, %v436_v54  ;;  %v1922_v6 = vpop.f32.mrf.mxu1 }
0x111f   :  { %v1864_v4 = vpop.f32.mrf.mxu3 }
0x1120   :  { %v1808_v2 = vadd.f32 %v1807_v0, %v1767_v1 }
0x1122   :  { %v1838_v62 = vadd.f32 %v1837_v3, %v1808_v2 }
0x1124   :  { %v1865_v29 = vadd.f32 %v1864_v4, %v1838_v62 }
0x1125   :  { %v1897_v10 = vpop.f32.mrf.mxu0 }
0x1126   :  { %v1898_v5 = vadd.f32 %v1897_v10, %v1865_v29 }
0x1128   :  { %v1923_v21 = vadd.f32 %v1922_v6, %v1898_v5 }
0x112a   :  { %v1925_v63 = vmul.f32 %v1923_v21, %v2322_v9 }
0x112c   :  { %2198 = vtanh.f32 %v1925_v63 }
0x1132   :  { %v2199_v7 = vpop.eup %2198 }
0x1133   :  { %v1927_v17 = vmul.f32 %v2199_v7, %v2322_v9  ;;  %v1948_v9 = vld [vmem:[%s2708_s4 + $0x10] sm:$0xff] }
0x1134   :  { %v1973_v35 = vand.u32 4294901760, %v1948_v9 }
0x1135   :  { %v1928_v26 = vadd.f32 %v1927_v17, %v2329_v15  ;;  %v1971_v15 = vand.u32 4294901760, %v1949_v33 }
0x1136   :  { %v2007_v25 = vsub.f32 %v1948_v9, %v1973_v35 }
0x1137   :  { %1931 = vrot.lane.b32.xlu1 %v1928_v26, %s2207_s3  ;;  %v1929_v24 = vmul.f32 %v1928_v26, %v1728_v12  ;;  %v2001_v36 = vsub.f32 %v1949_v33, %v1971_v15  ;;  %2072 = vmatpush.msrb.mxu1 %v1971_v15 }
0x1138   :  { %1972 = vmatpush.msrb.mxu2 %v1971_v15  ;;  %v2008_v41 = vand.u32 4294901760, %v2007_v25 }
0x1139   :  { %v2002_v37 = vand.u32 4294901760, %v2001_v36  ;;  %2043 = vmatpush.msrb.mxu0 %v2001_v36  ;;  %2074 = vmatpush.msrb.mxu1 %v1973_v35 }
0x113a   :  { %1974 = vmatpush.msrb.mxu2 %v1973_v35  ;;  %v2009_v50 = vsub.f32 %v2007_v25, %v2008_v41 }
0x113b   :  { %v2003_v42 = vsub.f32 %v2001_v36, %v2002_v37  ;;  %2046 = vmatpush.msrb.mxu0 %v2007_v25  ;;  %2076 = vmatpush.msrb.mxu1 %v1975_v39 }
0x113c   :  { %v2010_v51 = vand.u32 4294901760, %v2009_v50  ;;  %1976 = vmatpush.msrb.mxu2 %v1975_v39 }
0x113d   :  { %v2004_v46 = vand.u32 4294901760, %v2003_v42  ;;  %2049 = vmatpush.msrb.mxu0 %v2013_v30  ;;  %2078 = vmatpush.msrb.mxu1 %v1977_v45 }
0x113e   :  { %1978 = vmatpush.msrb.mxu2 %v1977_v45 }
0x113f   :  { %2005 = vmatpush.msrb.mxu3 %v2004_v46  ;;  %2052 = vmatpush.msrb.mxu0 %v2019_v48 }
0x1140   :  { %2101 = vmatpush.msra.mxu2 %v2002_v37 }
0x1141   :  { %2011 = vmatpush.msrb.mxu3 %v2010_v51 }
0x1142   :  { %2105 = vmatpush.msra.mxu2 %v2008_v41 }
0x1143   :  { %2017 = vmatpush.msrb.mxu3 %v2016_v34 }
0x1144   :  { %2109 = vmatpush.msra.mxu2 %v2014_v53 }
0x1145   :  { %2023 = vmatpush.msrb.mxu3 %v2022_v40 }
0x1146   :  { %2113 = vmatpush.msra.mxu2 %v2020_v19 }
0x1147   :  { %2132 = vmatpush.msra.mxu3 %v1971_v15 }
0x1149   :  { %2134 = vmatpush.msra.mxu3 %v1973_v35 }
0x114b   :  { %2136 = vmatpush.msra.mxu3 %v1975_v39 }
0x114d   :  { %2138 = vmatpush.msra.mxu3 %v1977_v45 }
0x11a9   :  { %v1932_v27 = vpop.permute.xlu1 %1931 }
0x11aa   :  { %v1934_v23 = vmul.f32 %v1932_v27, %v1928_v26 }
0x11ac   :  { %1936 = vrot.lane.b32.xlu2 %v1934_v23, %s2208_s17 }
0x1206   :  { %v1937_v28 = vpop.permute.xlu2 %1936 }
0x1207   :  { %v1939_v31 = vadd.f32 %v1937_v28, %v1929_v24 }
0x1209   :  { %2200 = vtanh.f32 %v1939_v31 }
0x120f   :  { %v2201_v32 = vpop.eup %2200 }
0x1210   :  { %1942 = vrot.lane.b32.xlu0 %v2201_v32, %s2207_s3 }
0x1282   :  { %v1943_v43 = vpop.permute.xlu0 %1942 }
0x1283   :  { %v1945_v38 = vmul.f32 %v1943_v43, %v1928_v26 }
0x1285   :  { %1955 = vrot.lane.b32.xlu1 %v1945_v38, %s2208_s17 }
0x12f7   :  { %v1956_v44 = vpop.permute.xlu1 %1955 }
0x12f8   :  { %v1957_v12 = vsel %vm467_vm4, %v1956_v44, 0 }
0x12f9   :  { %v1979_v13 = vand.u32 4294901760, %v1957_v12 }
0x12fb   :  { %v1980_v14 = vsub.f32 %v1957_v12, %v1979_v13  ;;  %2025 = vmatmul.f32.vlgmr.msrb.gmra.mxu3 %v1979_v13 }
0x12fd   :  { %v1981_v22 = vand.u32 4294901760, %v1980_v14  ;;  %2055 = vmatmul.f32.vlgmr.msrb.gmra.mxu0 %v1980_v14 }
0x12ff   :  { %v1982_v16 = vsub.f32 %v1980_v14, %v1981_v22  ;;  %2082 = vmatmul.f32.vlgmr.msrb.gmra.mxu1 %v1981_v22 }
0x1301   :  { %v1983_v18 = vand.u32 4294901760, %v1982_v16 }
0x1303   :  { %1984 = vmatmul.f32.vlgmr.msrb.gmra.mxu2 %v1983_v18  ;;  %2140 = vmatmul.f32.vlgmr.msra.gmra.mxu3 %v1979_v13 }
0x130b   :  { %2115 = vmatmul.f32.vlgmr.msra.gmra.mxu2 %v1979_v13 }
0x137a   :  { %v2056_v60 = vpop.f32.mrf.mxu0 }
0x137c   :  { %v2083_v59 = vpop.f32.mrf.mxu1 }
0x137e   :  { %v2026_v11 = vpop.f32.mrf.mxu3 }
0x1386   :  { %v1985_v58 = vpop.f32.mrf.mxu2  ;;  %v2141_v1 = vpop.f32.mrf.mxu3 }
0x1387   :  { %v1986_v8 = vadd.f32 %v2169_v57, %v1985_v58 }
0x1389   :  { %v2027_v55 = vadd.f32 %v2026_v11, %v1986_v8 }
0x138b   :  { %v2057_v56 = vadd.f32 %v2056_v60, %v2027_v55 }
0x138d   :  { %v2084_v54 = vadd.f32 %v2083_v59, %v2057_v56 }
0x138e   :  { %v2116_v0 = vpop.f32.mrf.mxu2 }
0x138f   :  { %v2117_v61 = vadd.f32 %v2116_v0, %v2084_v54 }
0x1391   :  { %v2142_v2 = vadd.f32 %v2141_v1, %v2117_v61 }
0x1393   :  { %v2145_v3 = vsel %vm2144_vm5, %v2142_v2, -inf }
0x1394   :  { %2146 = vmax.xlane.f32.xlu2 %v2145_v3 }
0x1407   :  { %v2147_v62 = vpop.xlane.xlu2 %2146 }
0x1408   :  { %v2148_v4 = vsub.f32 %v2142_v2, %v2147_v62 }
0x140a   :  { %v2149_v29 = vmul.f32 1.442695, %v2148_v4 }
0x140c   :  { %2202 = vpow2.f32 %v2149_v29 }
0x1412   :  { %v2203_v10 = vpop.eup %2202 }
0x1413   :  { %v2151_v5 = vsel %vm2144_vm5, %v2203_v10, 0.0 }
0x1414   :  { %2152 = vadd.xlane.f32.xlu0 %v2151_v5 }
0x1487   :  { %v2153_v6 = vpop.xlane.xlu0 %2152 }
0x1488   :  { %2204 = vrcp.f32 %v2153_v6 }
0x148e   :  { %v2205_v21 = vpop.eup %2204 }
0x148f   :  { %v2155_v63 = vmul.f32 %v2205_v21, %v2153_v6 }
0x1491   :  { %v2156_v7 = vsub.f32 2.0, %v2155_v63 }
0x1493   :  { %v2157_v17 = vmul.f32 %v2205_v21, %v2156_v7 }
0x1495   :  { %v2158_v26 = vmul.f32 %v2203_v10, %v2157_v17 }
0x1497   :  { %2159 = vst.msk [vmem:[%s2710_s6] sm:$0xff] %vm2144_vm5, %v2158_v26 }

</bundles_post_ra>
